<compile_context>
chip_gen: v6e
topology: v6e:2x2x1
jax: 0.10.0
libtpu: 0.0.40
codegen_flags: <defaults>
</compile_context>

<pallas_src>
import math
import jax
import jax.numpy as jnp
from jax.experimental import pallas as pl
from jax.experimental.pallas import tpu as pltpu


def _round_up(x, m):
    return (x + m - 1) // m * m


def _cdiv(a, b):
    return (a + b - 1) // b


# --------------------------------------------------------------------------
# Resident-weights kernel: 1-D grid over token tiles, w1/w2 fully in VMEM.
# --------------------------------------------------------------------------
def ffn_resident_kernel(x_ref, w1_ref, w2_ref, b2_ref, o_ref):
    # x_ref : (tm, d_model)            b2_ref : (1, d_model) f32  (= b1 @ w2 + b2)
    # w1_ref: (d_model, d_ff)          w2_ref : (d_ff, d_model)
    h = jnp.dot(x_ref[...], w1_ref[...], preferred_element_type=jnp.float32)
    # TODO(synk): training-mode dropout (pltpu.prng_random_bits mask) not wired in.
    out = jnp.dot(h.astype(w2_ref.dtype), w2_ref[...],
                  preferred_element_type=jnp.float32)
    o_ref[...] = (out + b2_ref[...]).astype(o_ref.dtype)


# --------------------------------------------------------------------------
# Chunked-d_ff fallback kernel: grid = (token tiles, d_ff chunks), f32 acc.
# --------------------------------------------------------------------------
def ffn_chunked_kernel(x_ref, w1_ref, w2_ref, b2_ref, o_ref, acc_ref):
    # x_ref : (tm, d_model)            w1_ref: (d_model, tk)
    # w2_ref: (tk, d_model)            b2_ref: (1, d_model) f32
    # acc_ref: (tm, d_model) f32 scratch, resident across the k axis.
    k = pl.program_id(1)

    @pl.when(k == 0)
    def _init():
        acc_ref[...] = jnp.zeros_like(acc_ref)

    h = jnp.dot(x_ref[...], w1_ref[...], preferred_element_type=jnp.float32)
    # TODO(synk): training-mode dropout (pltpu.prng_random_bits mask) not wired in.
    acc_ref[...] += jnp.dot(h.astype(w2_ref.dtype), w2_ref[...],
                            preferred_element_type=jnp.float32)

    @pl.when(k == pl.num_programs(1) - 1)
    def _finalize():
        o_ref[...] = (acc_ref[...] + b2_ref[...]).astype(o_ref.dtype)


# --------------------------------------------------------------------------
# Wrapper
# --------------------------------------------------------------------------
def positionwise_feed_forward(x, w1, b1, w2, b2, *,
                              compute_dtype=jnp.bfloat16,
                              tm_max=512, tk_max=1024,
                              vmem_budget_bytes=40 * 1024 * 1024):
    """x: (batch, seq, d_model); w1: (d_model, d_ff); w2: (d_ff, d_model)."""
    batch, seq, d_model = x.shape
    d_ff = w1.shape[1]
    M = batch * seq
    out_dtype = x.dtype

    c_item = jnp.dtype(compute_dtype).itemsize
    out_item = jnp.dtype(out_dtype).itemsize
    sublane = max(8, 32 // max(c_item, 1))          # 8 f32 / 16 bf16 / 32 int8

    # Fold b1 into an effective output bias (exact while dropout == identity).
    b2_eff = (b1.astype(jnp.float32) @ w2.astype(jnp.float32)
              + b2.astype(jnp.float32)).reshape(1, d_model)

    # --- token tiling: >= 2 tiles when possible (megacore), minimal padding -
    n_tiles = max(_cdiv(M, tm_max), 2) if M >= 2 * sublane else 1
    tm = _round_up(_cdiv(M, n_tiles), sublane)
    M_pad = n_tiles * tm

    x2d = x.reshape(M, d_model).astype(compute_dtype)
    if M_pad != M:
        x2d = jnp.pad(x2d, ((0, M_pad - M), (0, 0)))
    w1c = w1.astype(compute_dtype)
    w2c = w2.astype(compute_dtype)

    weight_bytes = 2 * d_model * d_ff * c_item                       # w1 + w2
    tile_bytes = 2 * tm * d_model * (c_item + out_item)              # dbl-buffered x + out
    # Conservative: assume Pallas double-buffers the weight inputs too.
    resident_need = 2 * weight_bytes + tile_bytes + 2 * d_model * 4
    resident_ok = resident_need <= vmem_budget_bytes

    if resident_ok:
        # ---------------- resident-weights fast path ----------------------
        vmem_limit = int(min(60 * 1024 * 1024,
                             max(32 * 1024 * 1024, resident_need + (4 << 20))))
        cost = pl.CostEstimate(
            flops=4 * M_pad * d_model * d_ff,
            transcendentals=0,
            bytes_accessed=(M_pad * d_model * (c_item + out_item)   # x + out
                            + weight_bytes                          # w1 + w2 once
                            + d_model * 4),                         # b2_eff
        )
        out = pl.pallas_call(
            ffn_resident_kernel,
            out_shape=jax.ShapeDtypeStruct((M_pad, d_model), out_dtype),
            grid_spec=pltpu.PrefetchScalarGridSpec(
                num_scalar_prefetch=0,
                grid=(n_tiles,),
                in_specs=[
                    pl.BlockSpec((tm, d_model), lambda i: (i, 0)),
                    pl.BlockSpec((d_model, d_ff), lambda i: (0, 0)),
                    pl.BlockSpec((d_ff, d_model), lambda i: (0, 0)),
                    pl.BlockSpec((1, d_model), lambda i: (0, 0)),
                ],
                out_specs=pl.BlockSpec((tm, d_model), lambda i: (i, 0)),
            ),
            compiler_params=pltpu.CompilerParams(
                dimension_semantics=("parallel",),
                vmem_limit_bytes=vmem_limit,
            ),
            cost_estimate=cost,
        )(x2d, w1c, w2c, b2_eff)
    else:
        # ---------------- chunked-d_ff fallback path -----------------------
        tk = min(tk_max, _round_up(d_ff, 128))
        d_ff_pad = _round_up(d_ff, tk)
        if d_ff_pad != d_ff:
            # Zero-padded w1 columns / w2 rows contribute nothing to the output
            # (bias is added only in the finalize via b2_eff).
            w1c = jnp.pad(w1c, ((0, 0), (0, d_ff_pad - d_ff)))
            w2c = jnp.pad(w2c, ((0, d_ff_pad - d_ff), (0, 0)))

        chunk_bytes = 2 * (2 * d_model * tk * c_item)                # dbl-buffered w1/w2 chunks
        acc_bytes = tm * d_model * 4
        need = tile_bytes + chunk_bytes + acc_bytes + 2 * d_model * 4
        vmem_limit = int(min(60 * 1024 * 1024,
                             max(32 * 1024 * 1024, need + (4 << 20))))
        cost = pl.CostEstimate(
            flops=4 * M_pad * d_model * d_ff_pad,
            transcendentals=0,
            bytes_accessed=(M_pad * d_model * (c_item + out_item)
                            # weights are re-streamed once per token tile:
                            + n_tiles * 2 * d_model * d_ff_pad * c_item
                            + d_model * 4),
        )
        out = pl.pallas_call(
            ffn_chunked_kernel,
            out_shape=jax.ShapeDtypeStruct((M_pad, d_model), out_dtype),
            grid_spec=pltpu.PrefetchScalarGridSpec(
                num_scalar_prefetch=0,
                grid=(n_tiles, d_ff_pad // tk),
                in_specs=[
                    pl.BlockSpec((tm, d_model), lambda i, k: (i, 0)),
                    pl.BlockSpec((d_model, tk), lambda i, k: (0, k)),
                    pl.BlockSpec((tk, d_model), lambda i, k: (k, 0)),
                    pl.BlockSpec((1, d_model), lambda i, k: (0, 0)),
                ],
                out_specs=pl.BlockSpec((tm, d_model), lambda i, k: (i, 0)),
                scratch_shapes=[pltpu.VMEM((tm, d_model), jnp.float32)],
            ),
            compiler_params=pltpu.CompilerParams(
                # Token tiles independent (megacore); d_ff axis is a reduction
                # into the resident accumulator -> "arbitrary", placed last.
                dimension_semantics=("parallel", "arbitrary"),
                vmem_limit_bytes=vmem_limit,
            ),
            cost_estimate=cost,
        )(x2d, w1c, w2c, b2_eff)

    if M_pad != M:
        out = out[:M]
    return out.reshape(batch, seq, d_model)


def init_linear_params(key, in_features, out_features, dtype=jnp.float32):
    """Deterministic PyTorch-style nn.Linear init; returns W^T (in, out) and b."""
    kw, kb = jax.random.split(key)
    bound = 1.0 / math.sqrt(in_features)
    w_t = jax.random.uniform(kw, (in_features, out_features),
                             minval=-bound, maxval=bound, dtype=dtype)
    b = jax.random.uniform(kb, (out_features,),
                           minval=-bound, maxval=bound, dtype=dtype)
    return w_t, b


if __name__ == "__main__":
    # Small, lane-dense config: M = 300 -> 2 token tiles of 160 (bf16-packed,
    # only 20 padding rows); weights easily VMEM-resident on the default path.
    batch, seq, d_model, d_ff = 2, 150, 128, 768

    key = jax.random.PRNGKey(0)
    kx, k1, k2 = jax.random.split(key, 3)

    x = jax.random.normal(kx, (batch, seq, d_model), dtype=jnp.float32)
    w1, b1 = init_linear_params(k1, d_model, d_ff)   # nn.Linear(d_model, d_ff)
    w2, b2 = init_linear_params(k2, d_ff, d_model)   # nn.Linear(d_ff, d_model)

    # Pure-JAX f32 reference (dropout = identity in eval mode).
    ref = (x.reshape(-1, d_model) @ w1 + b1) @ w2 + b2
    ref = ref.reshape(batch, seq, d_model)

    # 1) Resident-weights fast path (default VMEM budget).
    out = positionwise_feed_forward(x, w1, b1, w2, b2)
    out = jax.block_until_ready(out)
    assert out.shape == (batch, seq, d_model)
    # Tolerance reflects bf16 inputs / intermediate with f32 MXU accumulation.
    assert jnp.allclose(out, ref, atol=3e-2, rtol=3e-2), (
        float(jnp.max(jnp.abs(out - ref))))

    # 2) Chunked-d_ff fallback path (forced via a tiny budget) - same result.
    out2 = positionwise_feed_forward(x, w1, b1, w2, b2,
                                     vmem_budget_bytes=64 * 1024, tk_max=256)
    out2 = jax.block_until_ready(out2)
    assert out2.shape == (batch, seq, d_model)
    assert jnp.allclose(out2, ref, atol=3e-2, rtol=3e-2), (
        float(jnp.max(jnp.abs(out2 - ref))))

    print("KERNEL_OK")
</pallas_src>

<mosaic_0001>
module attributes {stable_mosaic.version = 11 : i64} {
  func.func @ffn_resident_kernel(%arg0: i32, %arg1: memref<160x128xbf16, #tpu.memory_space<vmem>>, %arg2: memref<128x768xbf16, #tpu.memory_space<vmem>>, %arg3: memref<768x128xbf16, #tpu.memory_space<vmem>>, %arg4: memref<1x128xf32, #tpu.memory_space<vmem>>, %arg5: memref<160x128xf32, #tpu.memory_space<vmem>>) attributes {dimension_semantics = [#tpu.dimension_semantics<parallel>], iteration_bounds = array<i64: 2>, scalar_prefetch = 0 : i64, scratch_operands = 0 : i64, tpu.core_type = #tpu.core_type<tc>, window_params = [{transform_indices = @transform_0, window_bounds = array<i64: 160, 128>}, {pipeline_mode = #tpu.pipeline_mode<synchronous>, transform_indices = @transform_1, window_bounds = array<i64: 128, 768>}, {pipeline_mode = #tpu.pipeline_mode<synchronous>, transform_indices = @transform_2, window_bounds = array<i64: 768, 128>}, {pipeline_mode = #tpu.pipeline_mode<synchronous>, transform_indices = @transform_3, window_bounds = array<i64: 1, 128>}, {transform_indices = @transform_4, window_bounds = array<i64: 160, 128>}]} {
    %c0 = arith.constant 0 : index
    %c0_0 = arith.constant 0 : index
    %0 = vector.load %arg1[%c0, %c0_0] : memref<160x128xbf16, #tpu.memory_space<vmem>>, vector<160x128xbf16>
    %c0_1 = arith.constant 0 : index
    %c0_2 = arith.constant 0 : index
    %1 = vector.load %arg2[%c0_1, %c0_2] : memref<128x768xbf16, #tpu.memory_space<vmem>>, vector<128x768xbf16>
    %cst = arith.constant dense<0.000000e+00> : vector<160x768xf32>
    %2 = tpu.matmul %0, %1, %cst {dimension_numbers = #tpu.dot_dimension_numbers<[1], [0], [0], [1], [0, 0, 1, 1], [], []>} : vector<160x128xbf16>, vector<128x768xbf16>, vector<160x768xf32> -> vector<160x768xf32>
    %3 = arith.truncf %2 : vector<160x768xf32> to vector<160x768xbf16>
    %c0_3 = arith.constant 0 : index
    %c0_4 = arith.constant 0 : index
    %4 = vector.load %arg3[%c0_3, %c0_4] : memref<768x128xbf16, #tpu.memory_space<vmem>>, vector<768x128xbf16>
    %cst_5 = arith.constant dense<0.000000e+00> : vector<160x128xf32>
    %5 = tpu.matmul %3, %4, %cst_5 {dimension_numbers = #tpu.dot_dimension_numbers<[1], [0], [0], [1], [0, 0, 1, 1], [], []>} : vector<160x768xbf16>, vector<768x128xbf16>, vector<160x128xf32> -> vector<160x128xf32>
    %c0_6 = arith.constant 0 : index
    %c0_7 = arith.constant 0 : index
    %6 = vector.load %arg4[%c0_6, %c0_7] : memref<1x128xf32, #tpu.memory_space<vmem>>, vector<1x128xf32>
    %7 = vector.broadcast %6 : vector<1x128xf32> to vector<160x128xf32>
    %8 = arith.addf %5, %7 : vector<160x128xf32>
    %c0_8 = arith.constant 0 : index
    %c0_9 = arith.constant 0 : index
    %9 = vector.load %arg5[%c0_8, %c0_9] : memref<160x128xf32, #tpu.memory_space<vmem>>, vector<160x128xf32>
    tpu.vector_store %arg5[%c0_8, %c0_9], %8 {strides = array<i32>} : memref<160x128xf32, #tpu.memory_space<vmem>>, vector<160x128xf32>,
    return
  }
  func.func @transform_0(%arg0: i32) -> (i32, i32) {
    %c0_i32 = arith.constant 0 : i32
    %c0_i32_0 = arith.constant 0 : i32
    return %arg0, %c0_i32 : i32, i32
  }
  func.func @transform_1(%arg0: i32) -> (i32, i32) {
    %c0_i32 = arith.constant 0 : i32
    %c0_i32_0 = arith.constant 0 : i32
    %c0_i32_1 = arith.constant 0 : i32
    return %c0_i32, %c0_i32_0 : i32, i32
  }
  func.func @transform_2(%arg0: i32) -> (i32, i32) {
    %c0_i32 = arith.constant 0 : i32
    %c0_i32_0 = arith.constant 0 : i32
    %c0_i32_1 = arith.constant 0 : i32
    return %c0_i32, %c0_i32_0 : i32, i32
  }
  func.func @transform_3(%arg0: i32) -> (i32, i32) {
    %c0_i32 = arith.constant 0 : i32
    %c0_i32_0 = arith.constant 0 : i32
    %c0_i32_1 = arith.constant 0 : i32
    return %c0_i32, %c0_i32_0 : i32, i32
  }
  func.func @transform_4(%arg0: i32) -> (i32, i32) {
    %c0_i32 = arith.constant 0 : i32
    %c0_i32_0 = arith.constant 0 : i32
    return %arg0, %c0_i32 : i32, i32
  }
}

</mosaic_0001>

<bundles_post_ra>
// kernel: tpu_custom_call.1
= control target key start
LH: loop header
LB: loop body
LE: loop exit
PB: predicated region body
PF: predicated region fallthrough
CT: control target
= control target key end

     0   :  { %9 = vsyncpa [#allocation3], 0  ;;  %s3139_s0 = inlined_call_operand.hbm [shape: bf16[320,128], index: 0, kind: input, shape index: {}]   ;;  %s3140_s1 = inlined_call_operand.hbm [shape: bf16[128,768], index: 1, kind: input, shape index: {}]   ;;  %s3141_s2 = inlined_call_operand.hbm [shape: bf16[768,128], index: 2, kind: input, shape index: {}]   ;;  %s3142_s3 = inlined_call_operand.vmem [shape: f32[1,128], index: 3, kind: input, shape index: {}]   ;;  %s3143_s4 = inlined_call_operand.hbm [shape: f32[320,128], index: 4, kind: output, shape index: {}]  }
   0x1   :  { %11 = vsyncpa [#allocation3 + $0x1], 0 }
   0x2   :  { %12 = vsyncpa [#allocation6], 0 }
   0x3   :  { %13 = vsyncpa [#allocation4], 0 }
   0x4   :  { %15 = vsyncpa [#allocation4 + $0x1], 0  ;;  %s2673_s15 = smov 0   ;;  %s2675_s16 = smov 0  }
   0x5   :  { %s2677_s17 = smov 0   ;;  %s2679_s18 = smov 0  }
   0x6 LB: > { %s2694_s19 = sadd.s32 4294967295, %s2635_s18   ;;  %s1931_s20 = sadd.s32 4294967294, %s2635_s18   ;;  %s2635_s18 = sphi %s2679_s18, %s3165_s18   ;;  %s2631_s17 = sphi %s2677_s17, %s3164_s17   ;;  %s2627_s16 = sphi %s2675_s16, %s3163_s16   ;;  %s2623_s15 = sphi %s2673_s15, %s3162_s15  }
   0x7   : > { %p41_p0 = scmp.ne.s32.totalorder %s2627_s16, %s2623_s15  ;;  %p3144_p1 = scmp.eq.s32.totalorder %s2694_s19, 0 }
   0x8   : > { %p134_p3 = scmp.eq.s32.totalorder %s1931_s20, 1  ;;  %p1932_p5 = scmp.ge.s32.totalorder %s2635_s18, 1 }
   0x9   : > { %p2703_p4 = por %p3144_p1, %p41_p0  ;;  %p141_p7 = scmp.lt.s32.totalorder %s2635_s18, 3 }
   0xa   : > { %p2708_p6 = por %p134_p3, %p41_p0  ;;  %s2637_s24 = smov [#allocation5]  }
   0xb   : > { %s3148_s21 = scalar_select %p2703_p4, 1, 0 }
   0xc   : > { %s3149_s22 = scalar_select %p2708_p6, 1, 0 }
   0xd   : > { %p2713_p8 = pnand %p1932_p5, %p141_p7  ;;  %s153_s25 = sshll.u32 %s2637_s24, 4  ;;  %s154_s25 = int_to_ptr.vmem [resolvable:$true] %s153_s25 }
   0xe   : > { %s2638_s27 = smov [#allocation7]   ;;  %s2498_s29 = scalar_lea.vmem %s154_s25, 6144 }
   0xf   : > { %s3150_s23 = scalar_select %p2713_p8, 1, 0 }
  0x10   : > { %p2295_p9 = pneg %p2713_p8  ;;  %s166_s28 = sshll.u32 %s2638_s27, 4  ;;  %s167_s28 = int_to_ptr.vmem [resolvable:$true] %s166_s28 }
  0x11   : > { %p2499_p13 = scmp.ne.s32.totalorder %s154_s25, %s2498_s29  ;;  %p2506_p5 = scmp.lt.s32.totalorder %s154_s25, %s154_s25 }
  0x12   : > { %p2722_p11 = pnand %p2295_p9, %p3144_p1  ;;  %p2507_p7 = scmp.lt.s32.totalorder %s2498_s29, %s2498_s29 }
  0x14   : > { %p2489_p12 = pneg %p2722_p11  ;;  %p2508_p10 = por %p2507_p7, %p2506_p5 }
  0x16   : > { %p2501_p0 = pnand %p2499_p13, %p2489_p12 }
  0x18   : > { %p2502_p3 = pneg %p2501_p0 }
  0x1a   : > { %p2509_p9 = pnand %p2508_p10, %p2502_p3 }
  0x1c   : > { %2512 = shalt.err (!%p2509_p9)
}
  0x1d   : > { %s2639_s30 = smov 384   ;;  %s2640_s5 = smov 24  }
  0x1e   : > { %2298 = dma.hbm_to_vmem [thread:$0]  (!%p2722_p11), %s3140_s1, 6144, %s154_s25, [#allocation6], %s2639_s30, %s2639_s30, %s2640_s5  }
  0x1f   : > { %s2524_s8 = scalar_lea.vmem %s167_s28, 6144  ;;  %p2532_p2 = scmp.lt.s32.totalorder %s167_s28, %s167_s28 }
  0x20   : > { %p2525_p1 = scmp.ne.s32.totalorder %s167_s28, %s2524_s8  ;;  %p2533_p6 = scmp.lt.s32.totalorder %s2524_s8, %s2524_s8 }
  0x22   : > { %p2527_p13 = pnand %p2525_p1, %p2489_p12  ;;  %p2534_p5 = por %p2533_p6, %p2532_p2 }
  0x24   : > { %p2528_p0 = pneg %p2527_p13 }
  0x26   : > { %p2535_p10 = pnand %p2534_p5, %p2528_p0 }
  0x28   : > { %2538 = shalt.err (!%p2535_p10)
}
  0x29   : > { %s2641_s9 = smov 64   ;;  %s2642_s10 = smov 4  }
  0x2a   : > { %2301 = dma.hbm_to_vmem [thread:$0]  (!%p2722_p11), %s3141_s2, 6144, %s167_s28, [#allocation6], %s2641_s9, %s2641_s9, %s2642_s10  }
  0x2b   : > { %s2748_s13 = sadd.s32 1, %s2635_s18   ;;  %s28_s20 = sadd.s32 1, %s2631_s17 }
  0x2c   : > { %s25_s14 = ssub.s32 %s2635_s18, %s2748_s13  ;;  %p35_p2 = scmp.ne.s32.totalorder %s2631_s17, %s2627_s16 }
  0x2d   : > { %p26_p1 = scmp.eq.s32.totalorder %s25_s14, 0  ;;  %p36_p6 = scmp.eq.s32.totalorder %s2635_s18, 0 }
  0x2e   : > { %p3152_p3 = scmp.eq.s32.totalorder %s2694_s19, 1  ;;  %p2312_p9 = scmp.lt.s32.totalorder %s2635_s18, 2 }
  0x2f   : > { %s2757_s24 = scalar_select %p26_p1, %s2631_s17, %s28_s20  }
  0x30   : > { %p37_p12 = por %p36_p6, %p35_p2  ;;  %p2761_p7 = por %p3152_p3, %p35_p2 }
  0x31   : > { %s183_s26 = sand.u32 1, %s2631_s17   ;;  %s2050_s28 = smul.u32 1280, %s2635_s18 }
  0x32   : > { %s3153_s25 = scalar_select %p2761_p7, 1, 0 }
  0x33   : > { %s2280_s27 = smul.u32 80, %s183_s26  ;;  %p2768_p11 = pnand %p2312_p9, %p37_p12 }
  0x34   : > { %s2775_s6 = scalar_lea.hbm %s3139_s0, %s2050_s28  ;;  %s2779_s11 = scalar_lea.sflag [#allocation3], %s183_s26 }
  0x35   : > { %s187_s7 = scalar_lea.vmem [#allocation2], %s2280_s27  ;;  %s2539_s12 = scalar_lea.hbm %s2775_s6, 1280 }
  0x36   : > { %s194_s8 = sshll.u32 %s187_s7, 4  ;;  %p2540_p13 = scmp.ne.s32.totalorder %s2775_s6, %s2539_s12  ;;  %s2777_s8 = int_to_ptr.vmem [resolvable:$true] %s194_s8 }
  0x37   : > { %p2541_p0 = pneg %p2768_p11  ;;  %s2544_s28 = scalar_lea.hbm %s3139_s0, 2560 }
  0x38   : > { %p2545_p1 = scmp.lt.s32.totalorder %s2775_s6, %s3139_s0  ;;  %p2546_p2 = scmp.lt.s32.totalorder %s2544_s28, %s2539_s12 }
  0x39   : > { %p2542_p5 = pnand %p2541_p0, %p2540_p13 }
  0x3a   : > { %p2547_p6 = por %p2546_p2, %p2545_p1 }
  0x3b   : > { %p2543_p10 = pneg %p2542_p5 }
  0x3d   : > { %p2548_p12 = pnand %p2547_p6, %p2543_p10 }
  0x3f   : > { %2551 = shalt.err (!%p2548_p12)
}
  0x40   : > { %s2552_s26 = scalar_lea.vmem %s2777_s8, 1280  ;;  %s2643_s27 = smov [#allocation2]  }
  0x41   : > { %p2553_p3 = scmp.ne.s32.totalorder %s2777_s8, %s2552_s26  ;;  %s2557_s7 = sshll.u32 %s2643_s27, 4  ;;  %s2558_s7 = int_to_ptr.vmem [resolvable:$false] %s2557_s7 }
  0x42   : > { %s2559_s14 = scalar_lea.vmem %s2558_s7, 2560  ;;  %p2560_p5 = scmp.lt.s32.totalorder %s2777_s8, %s2558_s7 }
  0x43   : > { %p2555_p9 = pnand %p2553_p3, %p2541_p0  ;;  %p2561_p7 = scmp.lt.s32.totalorder %s2559_s14, %s2552_s26 }
  0x45   : > { %p2556_p13 = pneg %p2555_p9  ;;  %p2562_p4 = por %p2561_p7, %p2560_p5 }
  0x47   : > { %p2563_p8 = pnand %p2562_p4, %p2556_p13 }
  0x49   : > { %2566 = shalt.err (!%p2563_p8)
}
  0x4a   : > { %2305 = dma.hbm_to_vmem [thread:$0]  (!%p2768_p11), %s2775_s6, 1280, %s2777_s8, %s2779_s11, %s2641_s9, %s2641_s9, %s2642_s10  }
  0x4b   : > { %p3155_p0 = scmp.ne.s32.totalorder %s3150_s23, 0 }
  0x4c   : > { %s2806_s12 = sand.u32 (!%p3155_p0), 1, %s2627_s16   ;;  %p3156_p4 = scmp.ne.s32.totalorder (!%p3155_p0), %s3148_s21, 0 }
  0x4d   : > { %206 = sbr.rel (%p3155_p0) target bundleno = 691 (0x2b3), region = 36  ;;  %s209_s28 = scalar_lea.sflag (!%p3155_p0), [#allocation3], %s2806_s12 }
  0x4e   : > { %s2281_s20 = smul.u32 (!%p3155_p0), 80, %s2806_s12 }
  0x50   : > { %s2810_s30 = scalar_lea.vmem (!%p3155_p0), [#allocation2], %s2281_s20 }
  0x52   : > { %2610 = dma.done.wait (%p3156_p4), %s209_s28, 1280  }
  0x53   : > { %2612 = vsyncadd (%p3156_p4), %s209_s28, 4294966016  ;;  %p3157_p8 = scmp.eq.s32.totalorder %s2694_s19, 0 }
  0x55   : > { %2614 = dma.done.wait (%p3157_p8), [#allocation6], 12288   ;;  %p3158_p7 = pmov %p3157_p8 }
  0x56   : > { %v2644_v0 = vmov 0   ;;  %v2357_v1 = vld [vmem:[#allocation5 + $0x154] ss:$24 sps:$4 sm:$0xff]   ;;  %v2359_v2 = vld [vmem:[#allocation5 + $0x150] ss:$24 sps:$4 sm:$0xff]   ;;  %v2439_v44 = vld [vmem:[#allocation7 + $0x78] sm:$0xff]  }
  0x57   : > { %2616 = vsyncadd (%p3158_p7), [#allocation6], 4294955008  ;;  %648 = vmatprep.mubr.bf16.mxu0 %v2644_v0  ;;  %781 = vmatprep.mubr.bf16.mxu1 %v2644_v0  ;;  %v2360_v3 = vld [vmem:[#allocation5 + $0x15c] ss:$24 sps:$4 sm:$0xff]   ;;  %v2362_v4 = vld [vmem:[#allocation5 + $0x158] ss:$24 sps:$4 sm:$0xff]  }
  0x58   : > { %616 = vmatprep.subr.bf16.mxu0 %v2357_v1  ;;  %v2363_v5 = vld [vmem:[#allocation5 + $0x124] ss:$24 sps:$4 sm:$0xff]   ;;  %v2365_v6 = vld [vmem:[#allocation5 + $0x120] ss:$24 sps:$4 sm:$0xff]   ;;  %749 = vmatprep.subr.bf16.mxu1 %v2360_v3  ;;  %v2369_v9 = vld [vmem:[#allocation5 + $0xf4] ss:$24 sps:$4 sm:$0xff]  }
  0x59   : > { %617 = vmatpush1.bf16.msra.mxu0 %v2359_v2  ;;  %v2366_v7 = vld [vmem:[#allocation5 + $0x12c] ss:$24 sps:$4 sm:$0xff]   ;;  %750 = vmatpush1.bf16.msra.mxu1 %v2362_v4  ;;  %v2368_v8 = vld [vmem:[#allocation5 + $0x128] ss:$24 sps:$4 sm:$0xff]   ;;  %v2372_v11 = vld [vmem:[#allocation5 + $0xfc] ss:$24 sps:$4 sm:$0xff]  }
  0x5a   : > { %618 = vmatprep.subr.bf16.mxu0 %v2363_v5  ;;  %751 = vmatprep.subr.bf16.mxu1 %v2366_v7  ;;  %v2371_v10 = vld [vmem:[#allocation5 + $0xf0] ss:$24 sps:$4 sm:$0xff]   ;;  %v2375_v12 = vld [vmem:[#allocation5 + $0xc4] ss:$24 sps:$4 sm:$0xff]   ;;  %v2377_v15 = vld [vmem:[#allocation5 + $0xc0] ss:$24 sps:$4 sm:$0xff]  }
  0x5b   : > { %v2374_v13 = vld [vmem:[#allocation5 + $0xf8] ss:$24 sps:$4 sm:$0xff]   ;;  %v2378_v14 = vld [vmem:[#allocation5 + $0xcc] ss:$24 sps:$4 sm:$0xff]   ;;  %v2380_v17 = vld [vmem:[#allocation5 + $0xc8] ss:$24 sps:$4 sm:$0xff]  }
  0x5c   : > { %v2381_v16 = vld [vmem:[#allocation5 + $0x94] ss:$24 sps:$4 sm:$0xff]   ;;  %v2383_v19 = vld [vmem:[#allocation5 + $0x90] ss:$24 sps:$4 sm:$0xff]   ;;  %v2387_v20 = vld [vmem:[#allocation5 + $0x64] ss:$24 sps:$4 sm:$0xff]  }
  0x5d   : > { %619 = vmatpush1.bf16.msra.mxu0 %v2365_v6  ;;  %752 = vmatpush1.bf16.msra.mxu1 %v2368_v8  ;;  %v2384_v18 = vld [vmem:[#allocation5 + $0x9c] ss:$24 sps:$4 sm:$0xff]   ;;  %v2386_v21 = vld [vmem:[#allocation5 + $0x98] ss:$24 sps:$4 sm:$0xff]   ;;  %v2390_v22 = vld [vmem:[#allocation5 + $0x6c] ss:$24 sps:$4 sm:$0xff]  }
  0x5e   : > { %620 = vmatprep.subr.bf16.mxu0 %v2369_v9  ;;  %753 = vmatprep.subr.bf16.mxu1 %v2372_v11  ;;  %v2389_v23 = vld [vmem:[#allocation5 + $0x60] ss:$24 sps:$4 sm:$0xff]   ;;  %v2393_v24 = vld [vmem:[#allocation5 + $0x34] ss:$24 sps:$4 sm:$0xff]   ;;  %v2395_v27 = vld [vmem:[#allocation5 + $0x30] ss:$24 sps:$4 sm:$0xff]  }
  0x5f   : > { %v2392_v25 = vld [vmem:[#allocation5 + $0x68] ss:$24 sps:$4 sm:$0xff]   ;;  %v2396_v26 = vld [vmem:[#allocation5 + $0x3c] ss:$24 sps:$4 sm:$0xff]   ;;  %v2398_v29 = vld [vmem:[#allocation5 + $0x38] ss:$24 sps:$4 sm:$0xff]  }
  0x60   : > { %v2399_v28 = vld [vmem:[#allocation5 + $0x4] ss:$24 sps:$4 sm:$0xff]   ;;  %v2401_v31 = vld [vmem:[#allocation5] ss:$24 sps:$4 sm:$0xff]   ;;  %v2412_v36 = vld [vmem:[#allocation5 + $0x134] ss:$24 sps:$4 sm:$0xff]  }
  0x61   : > { %621 = vmatpush1.bf16.msra.mxu0 %v2371_v10  ;;  %754 = vmatpush1.bf16.msra.mxu1 %v2374_v13  ;;  %v2402_v30 = vld [vmem:[#allocation5 + $0xc] ss:$24 sps:$4 sm:$0xff]   ;;  %v2404_v33 = vld [vmem:[#allocation5 + $0x8] ss:$24 sps:$4 sm:$0xff]   ;;  %v2440_v45 = vld [vmem:[#allocation7 + $0x38] sm:$0xff]   ;;  %s2282_s9 = smul.u32 160, %s2806_s12 }
  0x62   : > { %622 = vmatprep.subr.bf16.mxu0 %v2375_v12  ;;  %755 = vmatprep.subr.bf16.mxu1 %v2378_v14  ;;  %v2408_v32 = vld [vmem:[#allocation5 + $0x164] ss:$24 sps:$4 sm:$0xff]   ;;  %v2406_v35 = vld [vmem:[#allocation5 + $0x160] ss:$24 sps:$4 sm:$0xff]   ;;  %v2410_v37 = vld [vmem:[#allocation5 + $0x130] ss:$24 sps:$4 sm:$0xff]  }
  0x63   : > { %v2823_v34 = vld [vmem:[%s2810_s30] sm:$0xff]   ;;  %v2830_v39 = vld [vmem:[%s2810_s30 + $0x8] sm:$0xff]   ;;  %v2836_v46 = vld [vmem:[%s2810_s30 + $0x10] sm:$0xff]   ;;  %s3004_s10 = scalar_lea.vmem [#allocation8], %s2282_s9  ;;  %s2051_s29 = smul.u32 2560, %s2694_s19 }
  0x64   : > { %v2416_v38 = vld [vmem:[#allocation5 + $0x104] ss:$24 sps:$4 sm:$0xff]   ;;  %v2414_v40 = vld [vmem:[#allocation5 + $0x100] ss:$24 sps:$4 sm:$0xff]   ;;  %v2420_v41 = vld [vmem:[#allocation5 + $0xd4] ss:$24 sps:$4 sm:$0xff]  }
  0x65   : > { %623 = vmatpush1.bf16.msra.mxu0 %v2377_v15  ;;  %756 = vmatpush1.bf16.msra.mxu1 %v2380_v17  ;;  %v2418_v42 = vld [vmem:[#allocation5 + $0xd0] ss:$24 sps:$4 sm:$0xff]   ;;  %v2425_v43 = vld [vmem:[#allocation5 + $0xa4] ss:$24 sps:$4 sm:$0xff]   ;;  %v2423_v48 = vld [vmem:[#allocation5 + $0xa0] ss:$24 sps:$4 sm:$0xff]   ;;  %s3093_s5 = scalar_lea.hbm %s3143_s4, %s2051_s29 }
  0x66   : > { %624 = vmatprep.subr.bf16.mxu0 %v2381_v16  ;;  %757 = vmatprep.subr.bf16.mxu1 %v2384_v18  ;;  %v2441_v47 = vld [vmem:[#allocation7 + $0x70] sm:$0xff]   ;;  %v2443_v51 = vld [vmem:[#allocation7 + $0x68] sm:$0xff]   ;;  %v2433_v54 = vld [vmem:[#allocation5 + $0x44] ss:$24 sps:$4 sm:$0xff]   ;;  %s1839_s6 = sshll.u32 %s3004_s10, 4  ;;  %s1826_s26 = scalar_lea.sflag [#allocation4], %s2806_s12  ;;  %s3095_s6 = int_to_ptr.vmem [resolvable:$true] %s1839_s6 }
  0x67   : > { %v2429_v49 = vld [vmem:[#allocation5 + $0x74] ss:$24 sps:$4 sm:$0xff]   ;;  %v2427_v53 = vld [vmem:[#allocation5 + $0x70] ss:$24 sps:$4 sm:$0xff]   ;;  %v2431_v56 = vld [vmem:[#allocation5 + $0x40] ss:$24 sps:$4 sm:$0xff]  }
  0x68   : > { %v2442_v50 = vld [vmem:[#allocation7 + $0x30] sm:$0xff]   ;;  %v2444_v52 = vld [vmem:[#allocation7 + $0x28] sm:$0xff]   ;;  %v2445_v58 = vld [vmem:[#allocation7 + $0x60] sm:$0xff]   ;;  %s2567_s19 = scalar_lea.vmem %s3095_s6, 2560  ;;  %p3159_p10 = scmp.ne.s32.totalorder %s3153_s25, 0 }
  0x69   : > { %625 = vmatpush1.bf16.msra.mxu0 %v2383_v19  ;;  %758 = vmatpush1.bf16.msra.mxu1 %v2386_v21  ;;  %v2843_v55 = vld [vmem:[%s2810_s30 + $0x18] sm:$0xff]   ;;  %v2446_v59 = vld [vmem:[#allocation7 + $0x20] sm:$0xff]   ;;  %v2449_v2 = vld [vmem:[#allocation7 + $0x50] sm:$0xff]   ;;  %p2568_p11 = scmp.ne.s32.totalorder %s3095_s6, %s2567_s19  ;;  %s2645_s27 = smov [#allocation8]  }
  0x6a   : > { %626 = vmatprep.subr.bf16.mxu0 %v2387_v20  ;;  %759 = vmatprep.subr.bf16.mxu1 %v2390_v22  ;;  %v2437_v57 = vld [vmem:[#allocation5 + $0x14] ss:$24 sps:$4 sm:$0xff]   ;;  %v2435_v60 = vld [vmem:[#allocation5 + $0x10] ss:$24 sps:$4 sm:$0xff]   ;;  %v2447_v61 = vld [vmem:[#allocation7 + $0x58] sm:$0xff]   ;;  %s2571_s7 = sshll.u32 %s2645_s27, 4  ;;  %s2572_s7 = int_to_ptr.vmem [resolvable:$false] %s2571_s7 }
  0x6b   : > { %v2450_v62 = vld [vmem:[#allocation7 + $0xf8] sm:$0xff]   ;;  %v2851_v63 = vld [vmem:[%s2810_s30 + $0x20] sm:$0xff]   ;;  %v2457_v4 = vld [vmem:[#allocation7 + $0x48] sm:$0xff]   ;;  %p2569_p1 = pnand %p2568_p11, %p3159_p10  ;;  %s2573_s14 = scalar_lea.vmem %s2572_s7, 5120 }
  0x6c   : > { %v2448_v1 = vld [vmem:[#allocation7 + $0x18] sm:$0xff]   ;;  %v2451_v3 = vld [vmem:[#allocation7 + $0x10] sm:$0xff]   ;;  %v2458_v6 = vld [vmem:[#allocation7 + $0x8] sm:$0xff]   ;;  %p2574_p6 = scmp.lt.s32.totalorder %s3095_s6, %s2572_s7  ;;  %p2575_p12 = scmp.lt.s32.totalorder %s2573_s14, %s2567_s19 }
  0x6d   : > { %627 = vmatpush1.bf16.msra.mxu0 %v2389_v23  ;;  %760 = vmatpush1.bf16.msra.mxu1 %v2392_v25  ;;  %v2857_v5 = vld [vmem:[%s2810_s30 + $0x28] sm:$0xff]   ;;  %v2864_v7 = vld [vmem:[%s2810_s30 + $0x30] sm:$0xff]   ;;  %v2872_v8 = vld [vmem:[%s2810_s30 + $0x38] sm:$0xff]   ;;  %p2570_p2 = pneg %p2569_p1 }
  0x6e   : > { %628 = vmatprep.subr.bf16.mxu0 %v2393_v24  ;;  %761 = vmatprep.subr.bf16.mxu1 %v2396_v26  ;;  %v2434_v9 = vld [vmem:[%s2810_s30 + $0x40] sm:$0xff]   ;;  %v2438_v12 = vld [vmem:[%s2810_s30 + $0x48] sm:$0xff]   ;;  %p2576_p3 = por %p2575_p12, %p2574_p6 }
  0x6f   : > { %v2463_v10 = vld [vmem:[#allocation7 + $0x40] sm:$0xff]   ;;  %v2471_v13 = vld [vmem:[#allocation7 + $0x178] sm:$0xff]   ;;  %v2453_v15 = vld [vmem:[#allocation7 + $0xf0] sm:$0xff]  }
  0x70   : > { %v2465_v11 = vld [vmem:[#allocation7] sm:$0xff]   ;;  %v2452_v14 = vld [vmem:[#allocation7 + $0xb8] sm:$0xff]   ;;  %v2454_v16 = vld [vmem:[#allocation7 + $0xb0] sm:$0xff]   ;;  %p2577_p9 = pnand %p2576_p3, %p2570_p2 }
  0x71   : > { %629 = vmatpush1.bf16.msra.mxu0 %v2395_v27  ;;  %762 = vmatpush1.bf16.msra.mxu1 %v2398_v29  ;;  %v2455_v17 = vld [vmem:[#allocation7 + $0xe8] sm:$0xff]   ;;  %v2459_v19 = vld [vmem:[#allocation7 + $0xe0] sm:$0xff]   ;;  %v2461_v21 = vld [vmem:[#allocation7 + $0xd8] sm:$0xff]  }
  0x72   : > { %630 = vmatprep.subr.bf16.mxu0 %v2399_v28  ;;  %763 = vmatprep.subr.bf16.mxu1 %v2402_v30  ;;  %v2456_v18 = vld [vmem:[#allocation7 + $0xa8] sm:$0xff]   ;;  %v2460_v20 = vld [vmem:[#allocation7 + $0xa0] sm:$0xff]   ;;  %v2462_v22 = vld [vmem:[#allocation7 + $0x98] sm:$0xff]  }
  0x73   : > { %v2464_v23 = vld [vmem:[#allocation7 + $0xd0] sm:$0xff]   ;;  %v2467_v25 = vld [vmem:[#allocation7 + $0xc8] sm:$0xff]   ;;  %v2469_v27 = vld [vmem:[#allocation7 + $0xc0] sm:$0xff]  }
  0x74   : > { %v2466_v24 = vld [vmem:[#allocation7 + $0x90] sm:$0xff]   ;;  %v2468_v26 = vld [vmem:[#allocation7 + $0x88] sm:$0xff]   ;;  %v2470_v28 = vld [vmem:[#allocation7 + $0x80] sm:$0xff]  }
  0x75   : > { %631 = vmatpush1.bf16.msra.mxu0 %v2401_v31  ;;  %764 = vmatpush1.bf16.msra.mxu1 %v2404_v33 }
  0x76   : > { %882 = vmatprep.subr.bf16.mxu0 %v2408_v32  ;;  %2052 = vmatprep.subr.bf16.mxu1 %v2439_v44 }
  0x78   : > { %649 = vmatmul.mubr.bf16.vlgmr.msra.gmra.mxu0 %v2823_v34  ;;  %782 = vmatmul.mubr.bf16.vlgmr.msra.gmra.mxu1 %v2823_v34 }
  0x79   : > { %883 = vmatpush1.bf16.msra.mxu0 %v2406_v35  ;;  %658 = vmatprep.mubr.bf16.mxu0 %v2644_v0 }
  0x7a   : > { %884 = vmatprep.subr.bf16.mxu0 %v2412_v36  ;;  %791 = vmatprep.mubr.bf16.mxu1 %v2644_v0 }
  0x7b   : > { %2053 = vmatpush3.bf16.msra.mxu1 %v2440_v45 }
  0x7c   : > { %2054 = vmatprep.subr.bf16.mxu1 %v2441_v47 }
  0x7d   : > { %885 = vmatpush1.bf16.msra.mxu0 %v2410_v37  ;;  %v2472_v37 = vld [vmem:[#allocation7 + $0x138] sm:$0xff]  }
  0x7e   : > { %886 = vmatprep.subr.bf16.mxu0 %v2416_v38 }
  0x7f   : > { %2055 = vmatpush3.bf16.msra.mxu1 %v2442_v50 }
  0x80   : > { %659 = vmatmul.mubr.bf16.gmra.mxu0 %v2830_v39  ;;  %792 = vmatmul.mubr.bf16.gmra.mxu1 %v2830_v39 }
  0x81   : > { %668 = vmatprep.mubr.bf16.mxu0 %v2644_v0  ;;  %887 = vmatpush1.bf16.msra.mxu0 %v2414_v40 }
  0x82   : > { %888 = vmatprep.subr.bf16.mxu0 %v2420_v41  ;;  %801 = vmatprep.mubr.bf16.mxu1 %v2644_v0 }
  0x83   : > { %2056 = vmatprep.subr.bf16.mxu1 %v2443_v51 }
  0x84   : > { %2057 = vmatpush3.bf16.msra.mxu1 %v2444_v52  ;;  %v2476_v52 = vld [vmem:[#allocation7 + $0x128] sm:$0xff]  }
  0x85   : > { %889 = vmatpush1.bf16.msra.mxu0 %v2418_v42  ;;  %2058 = vmatprep.subr.bf16.mxu1 %v2445_v58  ;;  %v2473_v42 = vld [vmem:[#allocation7 + $0x170] sm:$0xff]  }
  0x86   : > { %890 = vmatprep.subr.bf16.mxu0 %v2425_v43 }
  0x88   : > { %669 = vmatmul.mubr.bf16.gmra.mxu0 %v2836_v46  ;;  %802 = vmatmul.mubr.bf16.gmra.mxu1 %v2836_v46 }
  0x89   : > { %678 = vmatprep.mubr.bf16.mxu0 %v2644_v0  ;;  %891 = vmatpush1.bf16.msra.mxu0 %v2423_v48  ;;  %v2475_v48 = vld [vmem:[#allocation7 + $0x168] sm:$0xff]  }
  0x8a   : > { %892 = vmatprep.subr.bf16.mxu0 %v2429_v49  ;;  %811 = vmatprep.mubr.bf16.mxu1 %v2644_v0 }
  0x8b   : > { %2059 = vmatpush3.bf16.msra.mxu1 %v2446_v59 }
  0x8c   : > { %2060 = vmatprep.subr.bf16.mxu1 %v2447_v61  ;;  %v2478_v61 = vld [vmem:[#allocation7 + $0x120] sm:$0xff]  }
  0x8d   : > { %893 = vmatpush1.bf16.msra.mxu0 %v2427_v53 }
  0x8e   : > { %894 = vmatprep.subr.bf16.mxu0 %v2433_v54 }
  0x8f   : > { %2061 = vmatpush3.bf16.msra.mxu1 %v2448_v1  ;;  %v2479_v1 = vld [vmem:[#allocation7 + $0x158] sm:$0xff]  }
  0x90   : > { %679 = vmatmul.mubr.bf16.gmra.mxu0 %v2843_v55  ;;  %812 = vmatmul.mubr.bf16.gmra.mxu1 %v2843_v55 }
  0x91   : > { %688 = vmatprep.mubr.bf16.mxu0 %v2644_v0  ;;  %895 = vmatpush1.bf16.msra.mxu0 %v2431_v56 }
  0x92   : > { %896 = vmatprep.subr.bf16.mxu0 %v2437_v57  ;;  %821 = vmatprep.mubr.bf16.mxu1 %v2644_v0  ;;  %v2477_v57 = vld [vmem:[#allocation7 + $0x160] sm:$0xff]  }
  0x93   : > { %2062 = vmatprep.subr.bf16.mxu1 %v2449_v2 }
  0x94   : > { %2063 = vmatpush3.bf16.msra.mxu1 %v2451_v3 }
  0x95   : > { %897 = vmatpush1.bf16.msra.mxu0 %v2435_v60  ;;  %2064 = vmatprep.subr.bf16.mxu1 %v2457_v4 }
  0x96   : > { %2128 = vmatprep.subr.bf16.mxu0 %v2450_v62 }
  0x98   : > { %689 = vmatmul.mubr.bf16.gmra.mxu0 %v2851_v63  ;;  %822 = vmatmul.mubr.bf16.gmra.mxu1 %v2851_v63 }
  0x99   : > { %698 = vmatprep.mubr.bf16.mxu0 %v2644_v0  ;;  %831 = vmatprep.mubr.bf16.mxu1 %v2644_v0 }
  0x9a   : > { %2065 = vmatpush3.bf16.msra.mxu1 %v2458_v6 }
  0x9b   : > { %2066 = vmatprep.subr.bf16.mxu1 %v2463_v10  ;;  %v2481_v10 = vld [vmem:[#allocation7 + $0x150] sm:$0xff]  }
  0x9e   : > { %2067 = vmatpush3.bf16.msra.mxu1 %v2465_v11 }
  0x9f   : > { %2204 = vmatprep.subr.bf16.mxu1 %v2471_v13 }
  0xa0   : > { %699 = vmatmul.mubr.bf16.gmra.mxu0 %v2857_v5  ;;  %832 = vmatmul.mubr.bf16.gmra.mxu1 %v2857_v5 }
  0xa1   : > { %708 = vmatprep.mubr.bf16.mxu0 %v2644_v0  ;;  %841 = vmatprep.mubr.bf16.mxu1 %v2644_v0 }
  0xa8   : > { %709 = vmatmul.mubr.bf16.gmra.mxu0 %v2864_v7  ;;  %842 = vmatmul.mubr.bf16.gmra.mxu1 %v2864_v7 }
  0xa9   : > { %718 = vmatprep.mubr.bf16.mxu0 %v2644_v0  ;;  %851 = vmatprep.mubr.bf16.mxu1 %v2644_v0 }
  0xb0   : > { %719 = vmatmul.mubr.bf16.gmra.mxu0 %v2872_v8  ;;  %852 = vmatmul.mubr.bf16.gmra.mxu1 %v2872_v8 }
  0xb1   : > { %728 = vmatprep.mubr.bf16.mxu0 %v2644_v0  ;;  %861 = vmatprep.mubr.bf16.mxu1 %v2644_v0 }
  0xb8   : > { %729 = vmatmul.mubr.bf16.gmra.mxu0 %v2434_v9  ;;  %862 = vmatmul.mubr.bf16.gmra.mxu1 %v2434_v9 }
  0xb9   : > { %738 = vmatprep.mubr.bf16.mxu0 %v2644_v0  ;;  %871 = vmatprep.mubr.bf16.mxu1 %v2644_v0 }
  0xc0   : > { %739 = vmatmul.mubr.bf16.gmra.mxu0 %v2438_v12  ;;  %872 = vmatmul.mubr.bf16.gmra.mxu1 %v2438_v12 }
  0xc1   : > { %914 = vmatprep.mubr.bf16.mxu0 %v2644_v0 }
  0xc8   : > { %915 = vmatmul.mubr.bf16.vlgmr.msra.gmra.mxu0 %v2823_v34 }
  0xc9   : > { %924 = vmatprep.mubr.bf16.mxu0 %v2644_v0  ;;  %2129 = vmatpush3.bf16.msra.mxu0 %v2452_v14  ;;  %v2482_v14 = vld [vmem:[#allocation7 + $0x110] sm:$0xff]  }
  0xca   : > { %2130 = vmatprep.subr.bf16.mxu0 %v2453_v15 }
  0xcd   : > { %2131 = vmatpush3.bf16.msra.mxu0 %v2454_v16 }
  0xce   : > { %2132 = vmatprep.subr.bf16.mxu0 %v2455_v17  ;;  %v2483_v17 = vld [vmem:[#allocation7 + $0x148] sm:$0xff]  }
  0xd0   : > { %925 = vmatmul.mubr.bf16.gmra.mxu0 %v2830_v39 }
  0xd1   : > { %934 = vmatprep.mubr.bf16.mxu0 %v2644_v0  ;;  %2133 = vmatpush3.bf16.msra.mxu0 %v2456_v18 }
  0xd2   : > { %2134 = vmatprep.subr.bf16.mxu0 %v2459_v19 }
  0xd5   : > { %2135 = vmatpush3.bf16.msra.mxu0 %v2460_v20 }
  0xd6   : > { %2136 = vmatprep.subr.bf16.mxu0 %v2461_v21  ;;  %v2484_v21 = vld [vmem:[#allocation7 + $0x108] sm:$0xff]  }
  0xd8   : > { %935 = vmatmul.mubr.bf16.gmra.mxu0 %v2836_v46 }
  0xd9   : > { %944 = vmatprep.mubr.bf16.mxu0 %v2644_v0  ;;  %2137 = vmatpush3.bf16.msra.mxu0 %v2462_v22 }
  0xda   : > { %2138 = vmatprep.subr.bf16.mxu0 %v2464_v23 }
  0xdd   : > { %2139 = vmatpush3.bf16.msra.mxu0 %v2466_v24 }
  0xde   : > { %2140 = vmatprep.subr.bf16.mxu0 %v2467_v25 }
  0xe0   : > { %945 = vmatmul.mubr.bf16.gmra.mxu0 %v2843_v55 }
  0xe1   : > { %954 = vmatprep.mubr.bf16.mxu0 %v2644_v0  ;;  %2141 = vmatpush3.bf16.msra.mxu0 %v2468_v26  ;;  %v2485_v26 = vld [vmem:[#allocation7 + $0x140] sm:$0xff]  }
  0xe2   : > { %2142 = vmatprep.subr.bf16.mxu0 %v2469_v27 }
  0xe5   : > { %2143 = vmatpush3.bf16.msra.mxu0 %v2470_v28 }
  0xe8   : > { %955 = vmatmul.mubr.bf16.gmra.mxu0 %v2851_v63 }
  0xe9   : > { %964 = vmatprep.mubr.bf16.mxu0 %v2644_v0 }
  0xf0   : > { %965 = vmatmul.mubr.bf16.gmra.mxu0 %v2857_v5  ;;  %v2480_v5 = vld [vmem:[#allocation7 + $0x118] sm:$0xff]  }
  0xf1   : > { %974 = vmatprep.mubr.bf16.mxu0 %v2644_v0 }
  0xf8   : > { %975 = vmatmul.mubr.bf16.gmra.mxu0 %v2864_v7 }
  0xf9   : > { %984 = vmatprep.mubr.bf16.mxu0 %v2644_v0 }
 0x100   : > { %985 = vmatmul.mubr.bf16.gmra.mxu0 %v2872_v8 }
 0x101   : > { %994 = vmatprep.mubr.bf16.mxu0 %v2644_v0 }
 0x108   : > { %995 = vmatmul.mubr.bf16.gmra.mxu0 %v2434_v9 }
 0x109   : > { %1004 = vmatprep.mubr.bf16.mxu0 %v2644_v0  ;;  %v2474_v0 = vld [vmem:[#allocation7 + $0x130] sm:$0xff]  }
 0x110   : > { %1005 = vmatmul.mubr.bf16.gmra.mxu0 %v2438_v12 }
 0x138   : > { %v650_v29 = vpop.f32.mrf.mxu0  ;;  %v783_v31 = vpop.f32.mrf.mxu1 }
 0x13a   : > { %v652_v30 = vpop.f32.mrf.mxu0  ;;  %v785_v33 = vpop.f32.mrf.mxu1 }
 0x13c   : > { %v654_v32 = vpop.f32.mrf.mxu0  ;;  %v787_v35 = vpop.f32.mrf.mxu1 }
 0x13d   : > { %v1015_v38 = vpack.c.bf16 %v654_v32, %v650_v29  ;;  %v1017_v39 = vpack.c.bf16 %v787_v35, %v783_v31 }
 0x13e   : > { %v656_v34 = vpop.f32.mrf.mxu0  ;;  %v789_v41 = vpop.f32.mrf.mxu1 }
 0x13f   : > { %v1016_v36 = vpack.c.bf16 %v656_v34, %v652_v30  ;;  %v1018_v43 = vpack.c.bf16 %v789_v41, %v785_v33  ;;  %v2486_v30 = vld [vmem:[#allocation7 + $0x100] sm:$0xff]  }
 0x140   : > { %v660_v40 = vpop.f32.mrf.mxu0  ;;  %v793_v45 = vpop.f32.mrf.mxu1 }
 0x141   : > { %1498 = vmatprep.mubr.bf16.mxu1 %v1016_v36  ;;  %1611 = vmatprep.mubr.bf16.mxu0 %v1018_v43 }
 0x142   : > { %v662_v44 = vpop.f32.mrf.mxu0  ;;  %1499 = vmatmul.mubr.bf16.vlgmr.msra.gmra.mxu1 %v1015_v38  ;;  %v795_v47 = vpop.f32.mrf.mxu1  ;;  %1612 = vmatmul.mubr.bf16.vlgmr.msra.gmra.mxu0 %v1017_v39 }
 0x143   : > { %2205 = vmatpush3.bf16.msra.mxu1 %v2472_v37 }
 0x144   : > { %v664_v46 = vpop.f32.mrf.mxu0  ;;  %2206 = vmatprep.subr.bf16.mxu1 %v2473_v42  ;;  %v797_v50 = vpop.f32.mrf.mxu1 }
 0x145   : > { %v1021_v53 = vpack.c.bf16 %v664_v46, %v660_v40  ;;  %v1023_v54 = vpack.c.bf16 %v797_v50, %v793_v45 }
 0x146   : > { %v666_v49 = vpop.f32.mrf.mxu0  ;;  %v799_v56 = vpop.f32.mrf.mxu1 }
 0x147   : > { %v1022_v51 = vpack.c.bf16 %v666_v49, %v662_v44  ;;  %2207 = vmatpush3.bf16.msra.mxu1 %v2474_v0  ;;  %v1024_v58 = vpack.c.bf16 %v799_v56, %v795_v47 }
 0x148   : > { %v670_v55 = vpop.f32.mrf.mxu0  ;;  %2208 = vmatprep.subr.bf16.mxu1 %v2475_v48  ;;  %v803_v60 = vpop.f32.mrf.mxu1 }
 0x149   : > { %1506 = vmatprep.mubr.bf16.mxu1 %v1022_v51  ;;  %1619 = vmatprep.mubr.bf16.mxu0 %v1024_v58 }
 0x14a   : > { %v672_v59 = vpop.f32.mrf.mxu0  ;;  %1507 = vmatmul.mubr.bf16.gmra.mxu1 %v1021_v53  ;;  %v805_v63 = vpop.f32.mrf.mxu1  ;;  %1620 = vmatmul.mubr.bf16.gmra.mxu0 %v1023_v54 }
 0x14b   : > { %2209 = vmatpush3.bf16.msra.mxu1 %v2476_v52 }
 0x14c   : > { %v674_v62 = vpop.f32.mrf.mxu0  ;;  %2210 = vmatprep.subr.bf16.mxu1 %v2477_v57  ;;  %v807_v3 = vpop.f32.mrf.mxu1 }
 0x14d   : > { %v1027_v6 = vpack.c.bf16 %v674_v62, %v670_v55  ;;  %v1029_v7 = vpack.c.bf16 %v807_v3, %v803_v60 }
 0x14e   : > { %v676_v2 = vpop.f32.mrf.mxu0  ;;  %v809_v9 = vpop.f32.mrf.mxu1 }
 0x14f   : > { %v1028_v4 = vpack.c.bf16 %v676_v2, %v672_v59  ;;  %2211 = vmatpush3.bf16.msra.mxu1 %v2478_v61  ;;  %v1030_v11 = vpack.c.bf16 %v809_v9, %v805_v63 }
 0x150   : > { %v680_v8 = vpop.f32.mrf.mxu0  ;;  %2212 = vmatprep.subr.bf16.mxu1 %v2479_v1  ;;  %v813_v13 = vpop.f32.mrf.mxu1 }
 0x151   : > { %1514 = vmatprep.mubr.bf16.mxu1 %v1028_v4  ;;  %1627 = vmatprep.mubr.bf16.mxu0 %v1030_v11 }
 0x152   : > { %v682_v12 = vpop.f32.mrf.mxu0  ;;  %1515 = vmatmul.mubr.bf16.gmra.mxu1 %v1027_v6  ;;  %v815_v16 = vpop.f32.mrf.mxu1  ;;  %1628 = vmatmul.mubr.bf16.gmra.mxu0 %v1029_v7 }
 0x153   : > { %2213 = vmatpush3.bf16.msra.mxu1 %v2480_v5 }
 0x154   : > { %v684_v15 = vpop.f32.mrf.mxu0  ;;  %2214 = vmatprep.subr.bf16.mxu1 %v2481_v10  ;;  %v817_v19 = vpop.f32.mrf.mxu1 }
 0x155   : > { %v1033_v22 = vpack.c.bf16 %v684_v15, %v680_v8  ;;  %v1035_v23 = vpack.c.bf16 %v817_v19, %v813_v13 }
 0x156   : > { %v686_v18 = vpop.f32.mrf.mxu0  ;;  %v819_v25 = vpop.f32.mrf.mxu1 }
 0x157   : > { %v1034_v20 = vpack.c.bf16 %v686_v18, %v682_v12  ;;  %2215 = vmatpush3.bf16.msra.mxu1 %v2482_v14  ;;  %v1036_v27 = vpack.c.bf16 %v819_v25, %v815_v16 }
 0x158   : > { %v690_v24 = vpop.f32.mrf.mxu0  ;;  %2216 = vmatprep.subr.bf16.mxu1 %v2483_v17  ;;  %v823_v29 = vpop.f32.mrf.mxu1 }
 0x159   : > { %1522 = vmatprep.mubr.bf16.mxu1 %v1034_v20  ;;  %1635 = vmatprep.mubr.bf16.mxu0 %v1036_v27 }
 0x15a   : > { %v692_v28 = vpop.f32.mrf.mxu0  ;;  %1523 = vmatmul.mubr.bf16.gmra.mxu1 %v1033_v22  ;;  %v825_v32 = vpop.f32.mrf.mxu1  ;;  %1636 = vmatmul.mubr.bf16.gmra.mxu0 %v1035_v23 }
 0x15b   : > { %2217 = vmatpush3.bf16.msra.mxu1 %v2484_v21 }
 0x15c   : > { %v694_v31 = vpop.f32.mrf.mxu0  ;;  %2218 = vmatprep.subr.bf16.mxu1 %v2485_v26  ;;  %v827_v34 = vpop.f32.mrf.mxu1 }
 0x15d   : > { %v1039_v36 = vpack.c.bf16 %v694_v31, %v690_v24  ;;  %v1041_v37 = vpack.c.bf16 %v827_v34, %v823_v29 }
 0x15e   : > { %v696_v33 = vpop.f32.mrf.mxu0  ;;  %v829_v39 = vpop.f32.mrf.mxu1 }
 0x15f   : > { %v1040_v35 = vpack.c.bf16 %v696_v33, %v692_v28  ;;  %2219 = vmatpush3.bf16.msra.mxu1 %v2486_v30  ;;  %v1042_v40 = vpack.c.bf16 %v829_v39, %v825_v32 }
 0x160   : > { %v700_v38 = vpop.f32.mrf.mxu0  ;;  %v833_v42 = vpop.f32.mrf.mxu1 }
 0x161   : > { %1530 = vmatprep.mubr.bf16.mxu1 %v1040_v35  ;;  %1643 = vmatprep.mubr.bf16.mxu0 %v1042_v40 }
 0x162   : > { %v702_v41 = vpop.f32.mrf.mxu0  ;;  %1531 = vmatmul.mubr.bf16.gmra.mxu1 %v1039_v36  ;;  %v835_v44 = vpop.f32.mrf.mxu1  ;;  %1644 = vmatmul.mubr.bf16.gmra.mxu0 %v1041_v37 }
 0x164   : > { %v704_v43 = vpop.f32.mrf.mxu0  ;;  %v837_v0 = vpop.f32.mrf.mxu1 }
 0x165   : > { %v1045_v47 = vpack.c.bf16 %v704_v43, %v700_v38  ;;  %v1047_v48 = vpack.c.bf16 %v837_v0, %v833_v42 }
 0x166   : > { %v706_v45 = vpop.f32.mrf.mxu0  ;;  %v839_v50 = vpop.f32.mrf.mxu1 }
 0x167   : > { %v1046_v46 = vpack.c.bf16 %v706_v45, %v702_v41  ;;  %v1048_v51 = vpack.c.bf16 %v839_v50, %v835_v44 }
 0x168   : > { %v710_v49 = vpop.f32.mrf.mxu0  ;;  %v843_v53 = vpop.f32.mrf.mxu1 }
 0x169   : > { %1538 = vmatprep.mubr.bf16.mxu1 %v1046_v46  ;;  %1651 = vmatprep.mubr.bf16.mxu0 %v1048_v51 }
 0x16a   : > { %v712_v52 = vpop.f32.mrf.mxu0  ;;  %1539 = vmatmul.mubr.bf16.gmra.mxu1 %v1045_v47  ;;  %v845_v55 = vpop.f32.mrf.mxu1  ;;  %1652 = vmatmul.mubr.bf16.gmra.mxu0 %v1047_v48 }
 0x16c   : > { %v714_v54 = vpop.f32.mrf.mxu0  ;;  %v847_v57 = vpop.f32.mrf.mxu1 }
 0x16d   : > { %v1051_v59 = vpack.c.bf16 %v714_v54, %v710_v49  ;;  %v1053_v60 = vpack.c.bf16 %v847_v57, %v843_v53 }
 0x16e   : > { %v716_v56 = vpop.f32.mrf.mxu0  ;;  %v849_v62 = vpop.f32.mrf.mxu1 }
 0x16f   : > { %v1052_v58 = vpack.c.bf16 %v716_v56, %v712_v52  ;;  %v1054_v63 = vpack.c.bf16 %v849_v62, %v845_v55 }
 0x170   : > { %v720_v61 = vpop.f32.mrf.mxu0  ;;  %v853_v2 = vpop.f32.mrf.mxu1 }
 0x171   : > { %1546 = vmatprep.mubr.bf16.mxu1 %v1052_v58  ;;  %1659 = vmatprep.mubr.bf16.mxu0 %v1054_v63 }
 0x172   : > { %v722_v1 = vpop.f32.mrf.mxu0  ;;  %1547 = vmatmul.mubr.bf16.gmra.mxu1 %v1051_v59  ;;  %v855_v4 = vpop.f32.mrf.mxu1  ;;  %1660 = vmatmul.mubr.bf16.gmra.mxu0 %v1053_v60 }
 0x174   : > { %v724_v3 = vpop.f32.mrf.mxu0  ;;  %v857_v6 = vpop.f32.mrf.mxu1 }
 0x175   : > { %v1057_v8 = vpack.c.bf16 %v724_v3, %v720_v61  ;;  %v1059_v9 = vpack.c.bf16 %v857_v6, %v853_v2 }
 0x176   : > { %v726_v5 = vpop.f32.mrf.mxu0  ;;  %v859_v11 = vpop.f32.mrf.mxu1 }
 0x177   : > { %v1058_v7 = vpack.c.bf16 %v726_v5, %v722_v1  ;;  %v1060_v12 = vpack.c.bf16 %v859_v11, %v855_v4 }
 0x178   : > { %v730_v10 = vpop.f32.mrf.mxu0  ;;  %v863_v14 = vpop.f32.mrf.mxu1 }
 0x179   : > { %1554 = vmatprep.mubr.bf16.mxu1 %v1058_v7  ;;  %1667 = vmatprep.mubr.bf16.mxu0 %v1060_v12 }
 0x17a   : > { %v732_v13 = vpop.f32.mrf.mxu0  ;;  %1555 = vmatmul.mubr.bf16.gmra.mxu1 %v1057_v8  ;;  %v865_v16 = vpop.f32.mrf.mxu1  ;;  %1668 = vmatmul.mubr.bf16.gmra.mxu0 %v1059_v9 }
 0x17c   : > { %v734_v15 = vpop.f32.mrf.mxu0  ;;  %v867_v18 = vpop.f32.mrf.mxu1 }
 0x17d   : > { %v1063_v20 = vpack.c.bf16 %v734_v15, %v730_v10  ;;  %v1065_v21 = vpack.c.bf16 %v867_v18, %v863_v14 }
 0x17e   : > { %v736_v17 = vpop.f32.mrf.mxu0  ;;  %v869_v23 = vpop.f32.mrf.mxu1 }
 0x17f   : > { %v1064_v19 = vpack.c.bf16 %v736_v17, %v732_v13  ;;  %v1066_v24 = vpack.c.bf16 %v869_v23, %v865_v16 }
 0x180   : > { %v740_v22 = vpop.f32.mrf.mxu0  ;;  %v873_v26 = vpop.f32.mrf.mxu1 }
 0x181   : > { %1562 = vmatprep.mubr.bf16.mxu1 %v1064_v19  ;;  %1675 = vmatprep.mubr.bf16.mxu0 %v1066_v24 }
 0x182   : > { %v742_v25 = vpop.f32.mrf.mxu0  ;;  %1563 = vmatmul.mubr.bf16.gmra.mxu1 %v1063_v20  ;;  %v875_v28 = vpop.f32.mrf.mxu1  ;;  %1676 = vmatmul.mubr.bf16.gmra.mxu0 %v1065_v21 }
 0x184   : > { %v744_v27 = vpop.f32.mrf.mxu0  ;;  %v877_v30 = vpop.f32.mrf.mxu1 }
 0x185   : > { %v1069_v32 = vpack.c.bf16 %v744_v27, %v740_v22  ;;  %v1071_v33 = vpack.c.bf16 %v877_v30, %v873_v26 }
 0x186   : > { %v746_v29 = vpop.f32.mrf.mxu0  ;;  %v879_v34 = vpop.f32.mrf.mxu1 }
 0x187   : > { %v1070_v31 = vpack.c.bf16 %v746_v29, %v742_v25  ;;  %v1072_v36 = vpack.c.bf16 %v879_v34, %v875_v28 }
 0x188   : > { %v916_v35 = vpop.f32.mrf.mxu0 }
 0x189   : > { %1570 = vmatprep.mubr.bf16.mxu1 %v1070_v31  ;;  %1683 = vmatprep.mubr.bf16.mxu0 %v1072_v36 }
 0x18a   : > { %v918_v37 = vpop.f32.mrf.mxu0  ;;  %1571 = vmatmul.mubr.bf16.gmra.mxu1 %v1069_v32  ;;  %1684 = vmatmul.mubr.bf16.gmra.mxu0 %v1071_v33 }
 0x18c   : > { %v920_v38 = vpop.f32.mrf.mxu0 }
 0x18d   : > { %v1019_v41 = vpack.c.bf16 %v920_v38, %v916_v35 }
 0x18e   : > { %v922_v39 = vpop.f32.mrf.mxu0 }
 0x18f   : > { %v1020_v40 = vpack.c.bf16 %v922_v39, %v918_v37 }
 0x190   : > { %v926_v42 = vpop.f32.mrf.mxu0 }
 0x191   : > { %1724 = vmatprep.mubr.bf16.mxu1 %v1020_v40 }
 0x192   : > { %v928_v43 = vpop.f32.mrf.mxu0  ;;  %1725 = vmatmul.mubr.bf16.vlgmr.msra.gmra.mxu1 %v1019_v41 }
 0x194   : > { %v930_v44 = vpop.f32.mrf.mxu0 }
 0x195   : > { %v1025_v46 = vpack.c.bf16 %v930_v44, %v926_v42 }
 0x196   : > { %v932_v45 = vpop.f32.mrf.mxu0 }
 0x197   : > { %v1026_v0 = vpack.c.bf16 %v932_v45, %v928_v43 }
 0x198   : > { %v936_v47 = vpop.f32.mrf.mxu0 }
 0x199   : > { %1732 = vmatprep.mubr.bf16.mxu1 %v1026_v0 }
 0x19a   : > { %v938_v48 = vpop.f32.mrf.mxu0  ;;  %1733 = vmatmul.mubr.bf16.gmra.mxu1 %v1025_v46 }
 0x19c   : > { %v940_v49 = vpop.f32.mrf.mxu0 }
 0x19d   : > { %v1031_v52 = vpack.c.bf16 %v940_v49, %v936_v47 }
 0x19e   : > { %v942_v50 = vpop.f32.mrf.mxu0 }
 0x19f   : > { %v1032_v51 = vpack.c.bf16 %v942_v50, %v938_v48 }
 0x1a0   : > { %v946_v53 = vpop.f32.mrf.mxu0 }
 0x1a1   : > { %1740 = vmatprep.mubr.bf16.mxu1 %v1032_v51 }
 0x1a2   : > { %v948_v54 = vpop.f32.mrf.mxu0  ;;  %1741 = vmatmul.mubr.bf16.gmra.mxu1 %v1031_v52 }
 0x1a4   : > { %v950_v55 = vpop.f32.mrf.mxu0 }
 0x1a5   : > { %v1037_v58 = vpack.c.bf16 %v950_v55, %v946_v53 }
 0x1a6   : > { %v952_v56 = vpop.f32.mrf.mxu0 }
 0x1a7   : > { %v1038_v57 = vpack.c.bf16 %v952_v56, %v948_v54 }
 0x1a8   : > { %v956_v59 = vpop.f32.mrf.mxu0 }
 0x1a9   : > { %1748 = vmatprep.mubr.bf16.mxu1 %v1038_v57 }
 0x1aa   : > { %v958_v60 = vpop.f32.mrf.mxu0  ;;  %1749 = vmatmul.mubr.bf16.gmra.mxu1 %v1037_v58 }
 0x1ac   : > { %v960_v61 = vpop.f32.mrf.mxu0 }
 0x1ad   : > { %v1043_v1 = vpack.c.bf16 %v960_v61, %v956_v59 }
 0x1ae   : > { %v962_v62 = vpop.f32.mrf.mxu0 }
 0x1af   : > { %v1044_v63 = vpack.c.bf16 %v962_v62, %v958_v60 }
 0x1b0   : > { %v966_v2 = vpop.f32.mrf.mxu0 }
 0x1b1   : > { %1756 = vmatprep.mubr.bf16.mxu1 %v1044_v63 }
 0x1b2   : > { %v968_v3 = vpop.f32.mrf.mxu0  ;;  %1757 = vmatmul.mubr.bf16.gmra.mxu1 %v1043_v1 }
 0x1b4   : > { %v970_v4 = vpop.f32.mrf.mxu0 }
 0x1b5   : > { %v1049_v7 = vpack.c.bf16 %v970_v4, %v966_v2 }
 0x1b6   : > { %v972_v5 = vpop.f32.mrf.mxu0 }
 0x1b7   : > { %v1050_v6 = vpack.c.bf16 %v972_v5, %v968_v3 }
 0x1b8   : > { %v976_v8 = vpop.f32.mrf.mxu0 }
 0x1b9   : > { %1764 = vmatprep.mubr.bf16.mxu1 %v1050_v6 }
 0x1ba   : > { %v978_v9 = vpop.f32.mrf.mxu0  ;;  %1765 = vmatmul.mubr.bf16.gmra.mxu1 %v1049_v7 }
 0x1bc   : > { %v980_v10 = vpop.f32.mrf.mxu0 }
 0x1bd   : > { %v1055_v13 = vpack.c.bf16 %v980_v10, %v976_v8 }
 0x1be   : > { %v982_v11 = vpop.f32.mrf.mxu0 }
 0x1bf   : > { %v1056_v12 = vpack.c.bf16 %v982_v11, %v978_v9 }
 0x1c0   : > { %v986_v14 = vpop.f32.mrf.mxu0 }
 0x1c1   : > { %1772 = vmatprep.mubr.bf16.mxu1 %v1056_v12 }
 0x1c2   : > { %v988_v15 = vpop.f32.mrf.mxu0  ;;  %1773 = vmatmul.mubr.bf16.gmra.mxu1 %v1055_v13 }
 0x1c4   : > { %v990_v16 = vpop.f32.mrf.mxu0 }
 0x1c5   : > { %v1061_v19 = vpack.c.bf16 %v990_v16, %v986_v14 }
 0x1c6   : > { %v992_v17 = vpop.f32.mrf.mxu0 }
 0x1c7   : > { %v1062_v18 = vpack.c.bf16 %v992_v17, %v988_v15 }
 0x1c8   : > { %v996_v20 = vpop.f32.mrf.mxu0 }
 0x1c9   : > { %1780 = vmatprep.mubr.bf16.mxu1 %v1062_v18 }
 0x1ca   : > { %v998_v21 = vpop.f32.mrf.mxu0  ;;  %1781 = vmatmul.mubr.bf16.gmra.mxu1 %v1061_v19 }
 0x1cc   : > { %v1000_v22 = vpop.f32.mrf.mxu0 }
 0x1cd   : > { %v1067_v25 = vpack.c.bf16 %v1000_v22, %v996_v20 }
 0x1ce   : > { %v1002_v23 = vpop.f32.mrf.mxu0 }
 0x1cf   : > { %v1068_v24 = vpack.c.bf16 %v1002_v23, %v998_v21 }
 0x1d0   : > { %v1006_v26 = vpop.f32.mrf.mxu0 }
 0x1d1   : > { %1788 = vmatprep.mubr.bf16.mxu1 %v1068_v24 }
 0x1d2   : > { %v1008_v27 = vpop.f32.mrf.mxu0  ;;  %1789 = vmatmul.mubr.bf16.gmra.mxu1 %v1067_v25 }
 0x1d4   : > { %v1010_v28 = vpop.f32.mrf.mxu0 }
 0x1d5   : > { %v1073_v31 = vpack.c.bf16 %v1010_v28, %v1006_v26 }
 0x1d6   : > { %v1012_v29 = vpop.f32.mrf.mxu0 }
 0x1d7   : > { %v1074_v30 = vpack.c.bf16 %v1012_v29, %v1008_v27 }
 0x1d9   : > { %1796 = vmatprep.mubr.bf16.mxu1 %v1074_v30 }
 0x1da   : > { %1797 = vmatmul.mubr.bf16.gmra.mxu1 %v1073_v31 }
 0x202   : > { %v2068_v32 = vpop.f32.mrf.mxu1  ;;  %v2900_v34 = vpop.f32.mrf.mxu0 }
 0x204   : > { %v2069_v33 = vpop.f32.mrf.mxu1  ;;  %v2904_v37 = vpop.f32.mrf.mxu0 }
 0x205   : > { %v2902_v35 = vadd.f32 %v2069_v33, %v2068_v32 }
 0x206   : > { %v2071_v36 = vpop.f32.mrf.mxu1  ;;  %v2906_v39 = vpop.f32.mrf.mxu0 }
 0x208   : > { %v2072_v38 = vpop.f32.mrf.mxu1  ;;  %v2910_v42 = vpop.f32.mrf.mxu0 }
 0x209   : > { %v2908_v40 = vadd.f32 %v2072_v38, %v2071_v36 }
 0x20a   : > { %v2074_v41 = vpop.f32.mrf.mxu1  ;;  %v2914_v45 = vpop.f32.mrf.mxu0 }
 0x20c   : > { %v2075_v43 = vpop.f32.mrf.mxu1  ;;  %v2918_v48 = vpop.f32.mrf.mxu0 }
 0x20d   : > { %v2912_v44 = vadd.f32 %v2075_v43, %v2074_v41 }
 0x20e   : > { %v2077_v0 = vpop.f32.mrf.mxu1  ;;  %v2922_v52 = vpop.f32.mrf.mxu0 }
 0x210   : > { %v2078_v46 = vpop.f32.mrf.mxu1  ;;  %v2926_v56 = vpop.f32.mrf.mxu0 }
 0x211   : > { %v2916_v47 = vadd.f32 %v2078_v46, %v2077_v0 }
 0x212   : > { %v2080_v49 = vpop.f32.mrf.mxu1  ;;  %v2930_v60 = vpop.f32.mrf.mxu0 }
 0x214   : > { %v2081_v50 = vpop.f32.mrf.mxu1  ;;  %v2934_v1 = vpop.f32.mrf.mxu0 }
 0x215   : > { %v2920_v51 = vadd.f32 %v2081_v50, %v2080_v49 }
 0x216   : > { %v2083_v53 = vpop.f32.mrf.mxu1  ;;  %v2938_v5 = vpop.f32.mrf.mxu0 }
 0x218   : > { %v2084_v54 = vpop.f32.mrf.mxu1  ;;  %v2942_v9 = vpop.f32.mrf.mxu0 }
 0x219   : > { %v2924_v55 = vadd.f32 %v2084_v54, %v2083_v53 }
 0x21a   : > { %v2086_v57 = vpop.f32.mrf.mxu1  ;;  %v2946_v13 = vpop.f32.mrf.mxu0 }
 0x21c   : > { %v2087_v58 = vpop.f32.mrf.mxu1  ;;  %v2950_v17 = vpop.f32.mrf.mxu0 }
 0x21d   : > { %v2928_v59 = vadd.f32 %v2087_v58, %v2086_v57  ;;  %v2981_v58 = vld [vmem:[%s3142_s3] ss:$0 sm:$0xff] }
 0x21e   : > { %v2089_v61 = vpop.f32.mrf.mxu1  ;;  %v2954_v21 = vpop.f32.mrf.mxu0 }
 0x220   : > { %v2090_v62 = vpop.f32.mrf.mxu1  ;;  %v2958_v25 = vpop.f32.mrf.mxu0 }
 0x221   : > { %v2932_v63 = vadd.f32 %v2090_v62, %v2089_v61 }
 0x222   : > { %v2092_v2 = vpop.f32.mrf.mxu1  ;;  %v2962_v29 = vpop.f32.mrf.mxu0 }
 0x224   : > { %v2093_v3 = vpop.f32.mrf.mxu1  ;;  %v2966_v33 = vpop.f32.mrf.mxu0 }
 0x225   : > { %v2936_v4 = vadd.f32 %v2093_v3, %v2092_v2  ;;  %v1501_v3 = vadd.f32 %v2902_v35, %v2981_v58 }
 0x226   : > { %v2095_v6 = vpop.f32.mrf.mxu1  ;;  %v2970_v43 = vpop.f32.mrf.mxu0 }
 0x228   : > { %v2096_v7 = vpop.f32.mrf.mxu1  ;;  %v2974_v50 = vpop.f32.mrf.mxu0 }
 0x229   : > { %v2940_v8 = vadd.f32 %v2096_v7, %v2095_v6  ;;  %v2146_v6 = vadd.f32 %v2904_v37, %v2900_v34 }
 0x22a   : > { %v2098_v10 = vpop.f32.mrf.mxu1  ;;  %v2983_v61 = vpop.f32.mrf.mxu0 }
 0x22c   : > { %v2099_v11 = vpop.f32.mrf.mxu1 }
 0x22d   : > { %v2944_v12 = vadd.f32 %v2099_v11, %v2098_v10  ;;  %v2991_v10 = vpop.f32.mrf.mxu0 }
 0x22e   : > { %v2101_v14 = vpop.f32.mrf.mxu1 }
 0x230   : > { %v2102_v15 = vpop.f32.mrf.mxu1 }
 0x231   : > { %v2948_v16 = vadd.f32 %v2102_v15, %v2101_v14  ;;  %v1614_v15 = vadd.f32 %v2146_v6, %v1501_v3  ;;  %v2158_v3 = vadd.f32 %v2934_v1, %v2930_v60 }
 0x232   : > { %v2104_v18 = vpop.f32.mrf.mxu1 }
 0x234   : > { %v2105_v19 = vpop.f32.mrf.mxu1 }
 0x235   : > { %v2952_v20 = vadd.f32 %v2105_v19, %v2104_v18  ;;  %v1504_v18 = vadd.f32 %v2908_v40, %v2981_v58  ;;  %v2149_v19 = vadd.f32 %v2910_v42, %v2906_v39 }
 0x236   : > { %v2107_v22 = vpop.f32.mrf.mxu1 }
 0x237   : > { %v1617_v37 = vadd.f32 %v2149_v19, %v1504_v18  ;;  %v2161_v18 = vadd.f32 %v2942_v9, %v2938_v5 }
 0x238   : > { %v2108_v23 = vpop.f32.mrf.mxu1 }
 0x239   : > { %v2956_v24 = vadd.f32 %v2108_v23, %v2107_v22  ;;  %v2998_v23 = vpop.f32.mrf.mxu0 }
 0x23a   : > { %v2110_v26 = vpop.f32.mrf.mxu1 }
 0x23b   : > { %v3007_v39 = vpop.f32.mrf.mxu0 }
 0x23c   : > { %v2111_v27 = vpop.f32.mrf.mxu1 }
 0x23d   : > { %v2960_v28 = vadd.f32 %v2111_v27, %v2110_v26  ;;  %v1509_v27 = vadd.f32 %v2912_v44, %v2981_v58  ;;  %v2155_v44 = vadd.f32 %v2926_v56, %v2922_v52 }
 0x23e   : > { %v2113_v30 = vpop.f32.mrf.mxu1 }
 0x240   : > { %v2114_v31 = vpop.f32.mrf.mxu1 }
 0x241   : > { %v2964_v32 = vadd.f32 %v2114_v31, %v2113_v30  ;;  %v2152_v30 = vadd.f32 %v2918_v48, %v2914_v45  ;;  %v3014_v48 = vpop.f32.mrf.mxu0 }
 0x242   : > { %v2116_v36 = vpop.f32.mrf.mxu1 }
 0x243   : > { %v3021_v6 = vpop.f32.mrf.mxu0 }
 0x244   : > { %v2117_v38 = vpop.f32.mrf.mxu1 }
 0x245   : > { %v2968_v41 = vadd.f32 %v2117_v38, %v2116_v36  ;;  %v1622_v38 = vadd.f32 %v2152_v30, %v1509_v27  ;;  %v3028_v19 = vpop.f32.mrf.mxu0 }
 0x246   : > { %v2119_v0 = vpop.f32.mrf.mxu1 }
 0x248   : > { %v2120_v46 = vpop.f32.mrf.mxu1 }
 0x249   : > { %v2972_v49 = vadd.f32 %v2120_v46, %v2119_v0  ;;  %v1512_v0 = vadd.f32 %v2916_v47, %v2981_v58 }
 0x24a   : > { %v2122_v53 = vpop.f32.mrf.mxu1 }
 0x24c   : > { %v2123_v54 = vpop.f32.mrf.mxu1 }
 0x24d   : > { %v2976_v57 = vadd.f32 %v2123_v54, %v2122_v53 }
 0x24e   : > { %v2125_v62 = vpop.f32.mrf.mxu1 }
 0x250   : > { %v2126_v2 = vpop.f32.mrf.mxu1 }
 0x251   : > { %v2989_v7 = vadd.f32 %v2126_v2, %v2125_v62  ;;  %v1625_v62 = vadd.f32 %v2155_v44, %v1512_v0  ;;  %v1517_v2 = vadd.f32 %v2920_v51, %v2981_v58  ;;  %v1533_v0 = vadd.f32 %v2936_v4, %v2981_v58 }
 0x252   : > { %v2220_v11 = vpop.f32.mrf.mxu1  ;;  %v2170_v44 = vadd.f32 %v2966_v33, %v2962_v29 }
 0x254   : > { %v2221_v14 = vpop.f32.mrf.mxu1 }
 0x255   : > { %v2222_v22 = vadd.f32 %v2221_v14, %v2220_v11  ;;  %v1630_v14 = vadd.f32 %v2158_v3, %v1517_v2 }
 0x256   : > { %v2223_v35 = vpop.f32.mrf.mxu1 }
 0x257   : > { %v1727_v26 = vadd.f32 %v2222_v22, %v1614_v15  ;;  %v1520_v15 = vadd.f32 %v2924_v55, %v2981_v58 }
 0x258   : > { %v2224_v34 = vpop.f32.mrf.mxu1 }
 0x259   : > { %1805 = vst [vmem:[%s3004_s10] sm:$0xff] %v1727_v26  ;;  %v2225_v40 = vadd.f32 %v2224_v34, %v2223_v35  ;;  %v1633_v35 = vadd.f32 %v2161_v18, %v1520_v15  ;;  %v1525_v26 = vadd.f32 %v2928_v59, %v2981_v58  ;;  %v2164_v34 = vadd.f32 %v2950_v17, %v2946_v13 }
 0x25a   : > { %v2226_v42 = vpop.f32.mrf.mxu1  ;;  %v1544_v18 = vadd.f32 %v2948_v16, %v2981_v58 }
 0x25b   : > { %v1730_v31 = vadd.f32 %v2225_v40, %v1617_v37  ;;  %v2184_v37 = vpop.f32.mrf.mxu0  ;;  %v1638_v30 = vadd.f32 %v2164_v34, %v1525_v26  ;;  %v1528_v40 = vadd.f32 %v2932_v63, %v2981_v58  ;;  %v2182_v26 = vadd.f32 %v3021_v6, %v3014_v48 }
 0x25c   : > { %v2227_v36 = vpop.f32.mrf.mxu1 }
 0x25d   : > { %1806 = vst [vmem:[%s3004_s10 + $0x8] sm:$0xff] %v1730_v31  ;;  %v2228_v45 = vadd.f32 %v2227_v36, %v2226_v42  ;;  %v2167_v42 = vadd.f32 %v2958_v25, %v2954_v21  ;;  %v2186_v59 = vpop.f32.mrf.mxu0 }
 0x25e   : > { %v2229_v46 = vpop.f32.mrf.mxu1 }
 0x25f   : > { %v1735_v53 = vadd.f32 %v2228_v45, %v1622_v38  ;;  %v1641_v38 = vadd.f32 %v2167_v42, %v1528_v40  ;;  %v2187_v63 = vpop.f32.mrf.mxu0 }
 0x260   : > { %v2230_v54 = vpop.f32.mrf.mxu1 }
 0x261   : > { %1807 = vst [vmem:[%s3004_s10 + $0x10] sm:$0xff] %v1735_v53  ;;  %v2231_v47 = vadd.f32 %v2230_v54, %v2229_v46  ;;  %v1646_v53 = vadd.f32 %v2170_v44, %v1533_v0  ;;  %v1536_v54 = vadd.f32 %v2940_v8, %v2981_v58  ;;  %v2189_v4 = vpop.f32.mrf.mxu0 }
 0x262   : > { %v2232_v52 = vpop.f32.mrf.mxu1 }
 0x263   : > { %v1738_v56 = vadd.f32 %v2231_v47, %v1625_v62  ;;  %v2173_v62 = vadd.f32 %v2974_v50, %v2970_v43  ;;  %v2190_v8 = vpop.f32.mrf.mxu0 }
 0x264   : > { %v2233_v11 = vpop.f32.mrf.mxu1  ;;  %v2191_v44 = vadd.f32 %v2190_v8, %v2189_v4 }
 0x265   : > { %1808 = vst [vmem:[%s3004_s10 + $0x18] sm:$0xff] %v1738_v56  ;;  %v2234_v51 = vadd.f32 %v2233_v11, %v2232_v52  ;;  %v1649_v47 = vadd.f32 %v2173_v62, %v1536_v54  ;;  %v1541_v52 = vadd.f32 %v2944_v12, %v2981_v58  ;;  %v2176_v56 = vadd.f32 %v2991_v10, %v2983_v61  ;;  %v2192_v12 = vpop.f32.mrf.mxu0 }
 0x266   : > { %v2235_v60 = vpop.f32.mrf.mxu1 }
 0x267   : > { %v1743_v1 = vadd.f32 %v2234_v51, %v1630_v14  ;;  %v1654_v15 = vadd.f32 %v2176_v56, %v1541_v52  ;;  %v2179_v51 = vadd.f32 %v3007_v39, %v2998_v23  ;;  %v2193_v16 = vpop.f32.mrf.mxu0 }
 0x268   : > { %v2236_v22 = vpop.f32.mrf.mxu1 }
 0x269   : > { %1809 = vst [vmem:[%s3004_s10 + $0x20] sm:$0xff] %v1743_v1  ;;  %v2237_v55 = vadd.f32 %v2236_v22, %v2235_v60  ;;  %v1657_v22 = vadd.f32 %v2179_v51, %v1544_v18  ;;  %v2195_v40 = vpop.f32.mrf.mxu0 }
 0x26a   : > { %v2238_v5 = vpop.f32.mrf.mxu1 }
 0x26b   : > { %v1746_v9 = vadd.f32 %v2237_v55, %v1633_v35  ;;  %v1549_v35 = vadd.f32 %v2952_v20, %v2981_v58 }
 0x26c   : > { %v2239_v27 = vpop.f32.mrf.mxu1 }
 0x26d   : > { %1810 = vst [vmem:[%s3004_s10 + $0x28] sm:$0xff] %v1746_v9  ;;  %v2240_v31 = vadd.f32 %v2239_v27, %v2238_v5  ;;  %v1662_v5 = vadd.f32 %v2182_v26, %v1549_v35  ;;  %v1552_v9 = vadd.f32 %v2956_v24, %v2981_v58  ;;  %v2185_v27 = vadd.f32 %v2184_v37, %v3028_v19 }
 0x26e   : > { %v2241_v36 = vpop.f32.mrf.mxu1  ;;  %v1560_v37 = vadd.f32 %v2964_v32, %v2981_v58 }
 0x26f   : > { %v1751_v13 = vadd.f32 %v2240_v31, %v1638_v30  ;;  %v1665_v6 = vadd.f32 %v2185_v27, %v1552_v9  ;;  %v1557_v31 = vadd.f32 %v2960_v28, %v2981_v58 }
 0x270   : > { %v2242_v17 = vpop.f32.mrf.mxu1 }
 0x271   : > { %1811 = vst [vmem:[%s3004_s10 + $0x30] sm:$0xff] %v1751_v13  ;;  %v2243_v45 = vadd.f32 %v2242_v17, %v2241_v36  ;;  %v2188_v36 = vadd.f32 %v2187_v63, %v2186_v59  ;;  %v2196_v17 = vpop.f32.mrf.mxu0  ;;  %v1673_v59 = vadd.f32 %v2191_v44, %v1560_v37  ;;  %v1565_v63 = vadd.f32 %v2968_v41, %v2981_v58 }
 0x272   : > { %v2244_v46 = vpop.f32.mrf.mxu1 }
 0x273   : > { %v1754_v21 = vadd.f32 %v2243_v45, %v1641_v38  ;;  %v1670_v19 = vadd.f32 %v2188_v36, %v1557_v31 }
 0x274   : > { %v2245_v25 = vpop.f32.mrf.mxu1 }
 0x275   : > { %1812 = vst [vmem:[%s3004_s10 + $0x38] sm:$0xff] %v1754_v21  ;;  %v2246_v2 = vadd.f32 %v2245_v25, %v2244_v46  ;;  %v2198_v46 = vpop.f32.mrf.mxu0 }
 0x276   : > { %v2247_v3 = vpop.f32.mrf.mxu1 }
 0x277   : > { %v1759_v29 = vadd.f32 %v2246_v2, %v1646_v53  ;;  %v2194_v53 = vadd.f32 %v2193_v16, %v2192_v12  ;;  %v2199_v62 = vpop.f32.mrf.mxu0  ;;  %v1576_v12 = vadd.f32 %v2989_v7, %v2981_v58 }
 0x278   : > { %v2248_v33 = vpop.f32.mrf.mxu1 }
 0x279   : > { %1813 = vst [vmem:[%s3004_s10 + $0x40] sm:$0xff] %v1759_v29  ;;  %v2249_v11 = vadd.f32 %v2248_v33, %v2247_v3  ;;  %v1678_v4 = vadd.f32 %v2194_v53, %v1565_v63  ;;  %v1568_v29 = vadd.f32 %v2972_v49, %v2981_v58  ;;  %v2197_v33 = vadd.f32 %v2196_v17, %v2195_v40  ;;  %v2201_v52 = vpop.f32.mrf.mxu0 }
 0x27a   : > { %v2250_v14 = vpop.f32.mrf.mxu1 }
 0x27b   : > { %v1762_v43 = vadd.f32 %v2249_v11, %v1649_v47  ;;  %v1681_v8 = vadd.f32 %v2197_v33, %v1568_v29 }
 0x27c   : > { %v2251_v50 = vpop.f32.mrf.mxu1 }
 0x27d   : > { %1814 = vst [vmem:[%s3004_s10 + $0x48] sm:$0xff] %v1762_v43  ;;  %v2252_v60 = vadd.f32 %v2251_v50, %v2250_v14  ;;  %v1573_v14 = vadd.f32 %v2976_v57, %v2981_v58  ;;  %v2200_v43 = vadd.f32 %v2199_v62, %v2198_v46 }
 0x27e   : > { %v2253_v1 = vpop.f32.mrf.mxu1 }
 0x27f   : > { %v1767_v61 = vadd.f32 %v2252_v60, %v1654_v15  ;;  %v2202_v15 = vpop.f32.mrf.mxu0  ;;  %v1686_v60 = vadd.f32 %v2200_v43, %v1573_v14 }
 0x280   : > { %v2254_v10 = vpop.f32.mrf.mxu1 }
 0x281   : > { %1815 = vst [vmem:[%s3004_s10 + $0x50] sm:$0xff] %v1767_v61  ;;  %v2255_v34 = vadd.f32 %v2254_v10, %v2253_v1  ;;  %v2203_v1 = vadd.f32 %v2202_v15, %v2201_v52 }
 0x282   : > { %v2256_v55 = vpop.f32.mrf.mxu1 }
 0x283   : > { %v1770_v23 = vadd.f32 %v2255_v34, %v1657_v22  ;;  %v1689_v35 = vadd.f32 %v2203_v1, %v1576_v12 }
 0x284   : > { %v2257_v39 = vpop.f32.mrf.mxu1 }
 0x285   : > { %1816 = vst [vmem:[%s3004_s10 + $0x58] sm:$0xff] %v1770_v23  ;;  %v2258_v30 = vadd.f32 %v2257_v39, %v2256_v55 }
 0x286   : > { %v2259_v20 = vpop.f32.mrf.mxu1 }
 0x287   : > { %v1775_v42 = vadd.f32 %v2258_v30, %v1662_v5 }
 0x288   : > { %v2260_v48 = vpop.f32.mrf.mxu1 }
 0x289   : > { %1817 = vst [vmem:[%s3004_s10 + $0x60] sm:$0xff] %v1775_v42  ;;  %v2261_v13 = vadd.f32 %v2260_v48, %v2259_v20 }
 0x28a   : > { %v2262_v38 = vpop.f32.mrf.mxu1 }
 0x28b   : > { %v1778_v24 = vadd.f32 %v2261_v13, %v1665_v6 }
 0x28c   : > { %v2263_v0 = vpop.f32.mrf.mxu1 }
 0x28d   : > { %1818 = vst [vmem:[%s3004_s10 + $0x68] sm:$0xff] %v1778_v24  ;;  %v2264_v45 = vadd.f32 %v2263_v0, %v2262_v38 }
 0x28e   : > { %v2265_v21 = vpop.f32.mrf.mxu1 }
 0x28f   : > { %v1783_v25 = vadd.f32 %v2264_v45, %v1670_v19 }
 0x290   : > { %v2266_v28 = vpop.f32.mrf.mxu1 }
 0x291   : > { %1819 = vst [vmem:[%s3004_s10 + $0x70] sm:$0xff] %v1783_v25  ;;  %v2267_v54 = vadd.f32 %v2266_v28, %v2265_v21 }
 0x292   : > { %v2268_v2 = vpop.f32.mrf.mxu1 }
 0x293   : > { %v1786_v3 = vadd.f32 %v2267_v54, %v1673_v59 }
 0x294   : > { %v2269_v32 = vpop.f32.mrf.mxu1 }
 0x295   : > { %1820 = vst [vmem:[%s3004_s10 + $0x78] sm:$0xff] %v1786_v3  ;;  %v2270_v47 = vadd.f32 %v2269_v32, %v2268_v2 }
 0x296   : > { %v2271_v56 = vpop.f32.mrf.mxu1 }
 0x297   : > { %v1791_v11 = vadd.f32 %v2270_v47, %v1678_v4 }
 0x298   : > { %v2272_v41 = vpop.f32.mrf.mxu1 }
 0x299   : > { %1821 = vst [vmem:[%s3004_s10 + $0x80] sm:$0xff] %v1791_v11  ;;  %v2273_v50 = vadd.f32 %v2272_v41, %v2271_v56 }
 0x29a   : > { %v2274_v49 = vpop.f32.mrf.mxu1 }
 0x29b   : > { %v1794_v18 = vadd.f32 %v2273_v50, %v1681_v8 }
 0x29c   : > { %v2275_v51 = vpop.f32.mrf.mxu1 }
 0x29d   : > { %1822 = vst [vmem:[%s3004_s10 + $0x88] sm:$0xff] %v1794_v18  ;;  %v2276_v61 = vadd.f32 %v2275_v51, %v2274_v49 }
 0x29e   : > { %v2277_v57 = vpop.f32.mrf.mxu1 }
 0x29f   : > { %v1799_v10 = vadd.f32 %v2276_v61, %v1686_v60 }
 0x2a0   : > { %v2278_v22 = vpop.f32.mrf.mxu1 }
 0x2a1   : > { %1823 = vst [vmem:[%s3004_s10 + $0x90] sm:$0xff] %v1799_v10  ;;  %v2279_v26 = vadd.f32 %v2278_v22, %v2277_v57 }
 0x2a3   : > { %v1802_v58 = vadd.f32 %v2279_v26, %v1689_v35 }
 0x2a5   : > { %1824 = vst [vmem:[%s3004_s10 + $0x98] sm:$0xff] %v1802_v58 }
 0x2a6   : > { %2580 = shalt.err (!%p2577_p9)
}
 0x2a7   : > { %s2581_s20 = scalar_lea.hbm %s3093_s5, 2560  ;;  %s2585_s21 = scalar_lea.hbm %s3143_s4, 5120 }
 0x2a8   : > { %p2582_p13 = scmp.ne.s32.totalorder %s3093_s5, %s2581_s20  ;;  %p2586_p4 = scmp.lt.s32.totalorder %s3093_s5, %s3143_s4 }
 0x2a9   : > { %p2587_p8 = scmp.lt.s32.totalorder %s2585_s21, %s2581_s20 }
 0x2aa   : > { %p2583_p5 = pnand %p2582_p13, %p3159_p10 }
 0x2ab   : > { %p2588_p7 = por %p2587_p8, %p2586_p4 }
 0x2ac   : > { %p2584_p0 = pneg %p2583_p5 }
 0x2ae   : > { %p2589_p11 = pnand %p2588_p7, %p2584_p0 }
 0x2b0   : > { %2592 = shalt.err (!%p2589_p11)
}
 0x2b1   : > { %s2646_s10 = smov 128   ;;  %s2647_s29 = smov 8  }
 0x2b2   : > { %2293 = dma.vmem_to_hbm [thread:$0]  (%p3159_p10), %s3095_s6, 2560, %s3093_s5, %s1826_s26, %s2646_s10, %s2646_s10, %s2647_s29  }
 0x2b3 PF: > { %s1854_s8 = sand.u32 1, %s2623_s15   ;;  %p3160_p1 = scmp.ne.s32.totalorder %s3149_s22, 0 }
 0x2b4   : > { %p3161_p2 = scmp.ge.s32.totalorder %s2635_s18, 2  ;;  %s1855_s11 = scalar_lea.sflag [#allocation4], %s1854_s8 }
 0x2b6   : > { %p2307_p6 = pnand %p3161_p2, %p3160_p1 }
 0x2b8   : > { %p2308_p12 = pneg %p2307_p6 }
 0x2ba   : > { %2618 = dma.done.wait (%p2308_p12), %s1855_s11, 2560  }
 0x2bb   : > { %2620 = vsyncadd (%p2308_p12), %s1855_s11, 4294964736  ;;  %p18_p3 = scmp.ge.s32.totalorder %s2748_s13, 4   ;;  %s3162_s15 = smov %s2627_s16 }
 0x2bc   : > { %s3163_s16 = smov %s2631_s17  ;;  %s3164_s17 = smov %s2757_s24 }
 0x2bd   : > { %s3165_s18 = smov %s2748_s13  ;;  %20 = sbr.rel (!%p18_p3) target bundleno = 6 (0x6), region = 89 }
 0x2c2   :  { %1860 = vsyncpa [#allocation3], 1 }
 0x2c3   :  { %1862 = vsyncpa [#allocation3 + $0x1], 1 }
 0x2c4   :  { %1863 = vsyncpa [#allocation6], 1 }
 0x2c5   :  { %1864 = vsyncpa [#allocation4], 1 }
 0x2c6   :  { %1866 = vsyncpa [#allocation4 + $0x1], 1 }

</bundles_post_ra>
